<compile_context>
chip_gen: v7x
topology: tpu7x:2x2x1
jax: 0.10.0
libtpu: 0.0.40
codegen_flags: <defaults>
</compile_context>

<pallas_src>
import math

import jax
import jax.numpy as jnp
from jax import lax
from jax.experimental import pallas as pl
from jax.experimental.pallas import tpu as pltpu

NUM_SAGE_LAYERS = 3
_BN_EPS = 1e-5
_NORM_EPS = 1e-12
_DIFFPOOL_EPS = 1e-15


def _default_vmem_limit():
    # Generation-aware scoped-VMEM cap (v5e/v6e 128 MiB, v7x 64 MiB physical).
    try:
        info = pltpu.get_tpu_info()
        cap = getattr(info, "vmem_capacity_bytes", None)
        if cap:
            return int(cap) * 3 // 4
    except Exception:
        pass
    return 48 * 1024 * 1024


_VMEM_LIMIT = _default_vmem_limit()


def _vmem_spec():
    return pl.BlockSpec(memory_space=pltpu.MemorySpace.VMEM)


# ----------------------------------------------------------------------------
# Kernel 1: both SAGEConvolutions stacks fused
#   (shared adj / inv_deg / layer-1 aggregation; channel-fused layer-2/3 aggs;
#    fused rel/root weights; single lane-concatenated output slab)
# ----------------------------------------------------------------------------
def make_fused_gnn_kernel(B, N, H):
    def kernel(x_ref, adj_ref,
               w1p_ref, w2p_ref, w3p_ref, wlin_ref, vecp_ref, b3p_ref, blin_ref,
               w1e_ref, w2e_ref, w3e_ref, vece_ref, b3e_ref,
               out_ref):
        adj = adj_ref[...]                                           # (B, N, N)
        # hoisted once, shared by all 6 DenseSAGEConv layers
        inv_deg = 1.0 / jnp.maximum(jnp.sum(adj, axis=-1, keepdims=True), 1.0)

        def aggregate(h2d):
            # mean-neighbor aggregation as one batched MXU matmul.
            # NOTE: N is a multiple of 8 so the (B*N,C)<->(B,N,C) reshapes are layout no-ops.
            c = h2d.shape[-1]
            h3d = h2d.reshape(B, N, c)
            agg = jnp.einsum("bij,bjc->bic", adj, h3d,
                             preferred_element_type=jnp.float32) * inv_deg
            return agg.reshape(B * N, c)

        def sage(h, agg, w_ref, b):
            # fused lin_rel/lin_root: one dot on [agg | h] with stacked [w_rel; w_root]
            out = jnp.dot(jnp.concatenate([agg, h], axis=-1), w_ref[...],
                          preferred_element_type=jnp.float32) + b
            # F.normalize(p=2, dim=-1) == out / max(||out||, eps)  (EUP rsqrt)
            ss = jnp.sum(out * out, axis=-1, keepdims=True)
            return out * lax.rsqrt(jnp.maximum(ss, _NORM_EPS * _NORM_EPS))

        inv_bn = 1.0 / float(B * N)

        def batch_norm(h, w, b):
            # BatchNorm1d (training mode) over flattened (B*N, C); single pass
            mean = jnp.sum(h, axis=0, keepdims=True) * inv_bn
            ex2 = jnp.sum(h * h, axis=0, keepdims=True) * inv_bn
            var = jnp.maximum(ex2 - mean * mean, 0.0)
            return (h - mean) * lax.rsqrt(var + _BN_EPS) * w + b

        x = x_ref[...]                                               # (B*N, C_in)
        agg_x = aggregate(x)                                         # shared by both trunks

        vecp = vecp_ref[...]   # rows: b1, bn1_w, bn1_b, b2, bn2_w, bn2_b  (pool trunk)
        vece = vece_ref[...]   # same layout, gnn_embed trunk

        # ---- layer 1 (both trunks share x / agg_x) ----
        h1p = batch_norm(jnp.maximum(sage(x, agg_x, w1p_ref, vecp[0:1]), 0.0),
                         vecp[1:2], vecp[2:3])
        h1e = batch_norm(jnp.maximum(sage(x, agg_x, w1e_ref, vece[0:1]), 0.0),
                         vece[1:2], vece[2:3])

        # ---- layer 2 (channel-fused aggregation: one 2H-wide adj einsum) ----
        agg1 = aggregate(jnp.concatenate([h1p, h1e], axis=-1))
        h2p = batch_norm(jnp.maximum(sage(h1p, agg1[:, :H], w2p_ref, vecp[3:4]), 0.0),
                         vecp[4:5], vecp[5:6])
        h2e = batch_norm(jnp.maximum(sage(h1e, agg1[:, H:], w2e_ref, vece[3:4]), 0.0),
                         vece[4:5], vece[5:6])

        # ---- layer 3 ----
        agg2 = aggregate(jnp.concatenate([h2p, h2e], axis=-1))
        h3p = sage(h2p, agg2[:, :H], w3p_ref, b3p_ref[...])
        h3e = sage(h2e, agg2[:, H:], w3e_ref, b3e_ref[...])

        # gnn_pool final Linear: one deep dot on the in-VMEM concat(h1p,h2p,h3p)
        s_logits = (jnp.dot(jnp.concatenate([h1p, h2p, h3p], axis=-1), wlin_ref[...],
                            preferred_element_type=jnp.float32) + blin_ref[...])

        # single lane-concatenated output slab: [s_logits | h1e | h2e | h3e]
        out_ref[...] = jnp.concatenate([s_logits, h1e, h2e, h3e], axis=-1)

    return kernel


def fused_sage_gnns(x, adj, p_pool, p_emb):
    B, N, C = x.shape
    H = p_pool["w_rel1"].shape[1]
    K = p_pool["w_rel3"].shape[1]
    F_emb = p_emb["w_rel3"].shape[1]
    W = K + 2 * H + F_emb

    def wcat(p, i):
        # stacked [w_rel; w_root] -> one dot per SAGE layer
        return jnp.concatenate([p["w_rel%d" % i], p["w_root%d" % i]], axis=0)

    def vecs(p):
        # pack the six (1,H) vectors into one (6,H) ref (fewer DMAs / descriptors)
        return jnp.concatenate([p["b1"], p["bn1_w"], p["bn1_b"],
                                p["b2"], p["bn2_w"], p["bn2_b"]], axis=0)

    args = [x.reshape(B * N, C), adj,
            wcat(p_pool, 1), wcat(p_pool, 2), wcat(p_pool, 3),
            p_pool["w_lin"], vecs(p_pool), p_pool["b3"], p_pool["b_lin"],
            wcat(p_emb, 1), wcat(p_emb, 2), wcat(p_emb, 3),
            vecs(p_emb), p_emb["b3"]]

    # TODO(synk): for large N stream adj from HBM (pl.ANY + emit_pipeline) instead of
    # holding the whole (B,N,N) block in VMEM; fine at these sizes.
    slab = pl.pallas_call(
        make_fused_gnn_kernel(B, N, H),
        out_shape=jax.ShapeDtypeStruct((B * N, W), jnp.float32),
        in_specs=[_vmem_spec()] * len(args),
        out_specs=_vmem_spec(),
        compiler_params=pltpu.CompilerParams(vmem_limit_bytes=_VMEM_LIMIT),
    )(*args)
    return slab.reshape(B, N, W)


# ----------------------------------------------------------------------------
# Kernel 2: dense_diff_pool + pooled-adjacency post-processing, grid over batch
# ----------------------------------------------------------------------------
def make_diffpool_post_kernel(N, K, D):
    def kernel(slab_ref, adj_ref, gd_ref,
               out_x_ref, out_adj_ref, s_out_ref, link_ref, ent_ref):
        slab = slab_ref[...]                                         # (N, K + D)
        ab = adj_ref[...]                                            # (N, N)

        logits = slab[:, :K]
        xb = slab[:, K:]

        # softmax over clusters (dim=-1)
        m = jnp.max(logits, axis=-1, keepdims=True)
        e = jnp.exp(logits - m)
        sb = e / jnp.sum(e, axis=-1, keepdims=True)
        s_out_ref[...] = sb

        # s^T x / s^T adj s via transposed-LHS dot_general (no materialized s.T)
        cT = (((0,), (0,)), ((), ()))
        out_x_ref[...] = lax.dot_general(sb, xb, cT,
                                         preferred_element_type=jnp.float32)   # (K, D)
        sta = lax.dot_general(sb, ab, cT, preferred_element_type=jnp.float32)  # (K, N)
        pooled = jnp.dot(sta, sb, preferred_element_type=jnp.float32)          # (K, K)
        sts = lax.dot_general(sb, sb, cT, preferred_element_type=jnp.float32)  # (K, K)

        row = lax.broadcasted_iota(jnp.int32, (K, K), 0)
        col = lax.broadcasted_iota(jnp.int32, (K, K), 1)
        diag = row == col

        # link-loss partial without s.s^T:
        #   ||adj - s s^T||_F^2 = sum(adj^2) - 2*trace(s^T adj s) + ||s^T s||_F^2
        sum_adj2 = jnp.sum(jnp.sum(ab * ab, axis=1, keepdims=True),
                           axis=0, keepdims=True)
        tr_pooled = jnp.sum(jnp.sum(jnp.where(diag, pooled, 0.0), axis=1, keepdims=True),
                            axis=0, keepdims=True)
        sum_sts2 = jnp.sum(jnp.sum(sts * sts, axis=1, keepdims=True),
                           axis=0, keepdims=True)
        link_ref[...] = sum_adj2 - 2.0 * tr_pooled + sum_sts2

        ent = -sb * jnp.log(sb + _DIFFPOOL_EPS)
        ent_ref[...] = jnp.sum(jnp.sum(ent, axis=1, keepdims=True),
                               axis=0, keepdims=True)

        # ---- pooled-adjacency post-processing ----
        mn = jnp.min(jnp.min(pooled, axis=1, keepdims=True), axis=0, keepdims=True)
        mx = jnp.max(jnp.max(pooled, axis=1, keepdims=True), axis=0, keepdims=True)
        # eps guard: PyTorch reference would NaN when mx == mn; exact divide (feeds a
        # hard threshold, so no approx reciprocal here)
        an = (pooled - mn) / jnp.maximum(mx - mn, 1e-12)

        # hard 2-class gumbel-softmax over [an, 1 - an] (tau=1), keep class 0;
        # gd = g0 - g1 gumbel-difference noise drawn host-side
        hard = jnp.where(an + gd_ref[...] >= 1.0 - an, 1.0, 0.0)

        # triu + triu^T, then diagonal := 1
        ut = jnp.where(col >= row, hard, 0.0)
        sym = ut + ut.T
        out_adj_ref[...] = jnp.where(diag, 1.0, sym)

    return kernel


def diffpool_and_postprocess(slab, adj, s_width, key):
    B, N, W = slab.shape
    K = s_width
    D = W - K

    # host-side gumbel noise (TPU in-kernel PRNG not available on the interpret path)
    g = jax.random.gumbel(key, (2, B, K, K), jnp.float32)
    gd = g[0] - g[1]

    out_shape = (
        jax.ShapeDtypeStruct((B, K, D), jnp.float32),   # pooled features
        jax.ShapeDtypeStruct((B, K, K), jnp.float32),   # post-processed adjacency
        jax.ShapeDtypeStruct((B, N, K), jnp.float32),   # softmaxed assignment s
        jax.ShapeDtypeStruct((B, 1, 1), jnp.float32),   # link-loss partial (per batch)
        jax.ShapeDtypeStruct((B, 1, 1), jnp.float32),   # entropy partial (per batch)
    )
    out_x, new_adj, s_soft, link_p, ent_p = pl.pallas_call(
        make_diffpool_post_kernel(N, K, D),
        grid=(B,),
        in_specs=[
            pl.BlockSpec((None, N, W), lambda b: (b, 0, 0)),
            pl.BlockSpec((None, N, N), lambda b: (b, 0, 0)),
            pl.BlockSpec((None, K, K), lambda b: (b, 0, 0)),
        ],
        out_specs=(
            pl.BlockSpec((None, K, D), lambda b: (b, 0, 0)),
            pl.BlockSpec((None, K, K), lambda b: (b, 0, 0)),
            pl.BlockSpec((None, N, K), lambda b: (b, 0, 0)),
            pl.BlockSpec((None, 1, 1), lambda b: (b, 0, 0)),
            pl.BlockSpec((None, 1, 1), lambda b: (b, 0, 0)),
        ),
        out_shape=out_shape,
        compiler_params=pltpu.CompilerParams(
            dimension_semantics=("parallel",),
            vmem_limit_bytes=_VMEM_LIMIT),
    )(slab, adj, gd)

    # tiny epilogue: global Frobenius norm / mean
    link = jnp.sqrt(jnp.maximum(jnp.sum(link_p), 0.0)) / float(B * N * N)
    ent = jnp.sum(ent_p) / float(B * N)
    return out_x, new_adj, link, ent, s_soft


# ----------------------------------------------------------------------------
# Parameter init (deterministic, shapes implied by the module __init__)
# ----------------------------------------------------------------------------
def _linear_init(key, fan_in, fan_out):
    bound = 1.0 / math.sqrt(fan_in)
    kw, kb = jax.random.split(key)
    w = jax.random.uniform(kw, (fan_in, fan_out), jnp.float32, -bound, bound)
    b = jax.random.uniform(kb, (1, fan_out), jnp.float32, -bound, bound)
    return w, b


def init_sage_params(key, c_in, hidden, c_out, use_lin):
    keys = jax.random.split(key, 7)
    p = {}
    # DenseSAGEConv: lin_rel has a bias, lin_root has no bias
    p["w_rel1"], p["b1"] = _linear_init(keys[0], c_in, hidden)
    p["w_root1"], _ = _linear_init(keys[1], c_in, hidden)
    p["w_rel2"], p["b2"] = _linear_init(keys[2], hidden, hidden)
    p["w_root2"], _ = _linear_init(keys[3], hidden, hidden)
    p["w_rel3"], p["b3"] = _linear_init(keys[4], hidden, c_out)
    p["w_root3"], _ = _linear_init(keys[5], hidden, c_out)
    p["bn1_w"] = jnp.ones((1, hidden), jnp.float32)       # PyTorch BN default init
    p["bn1_b"] = jnp.zeros((1, hidden), jnp.float32)
    p["bn2_w"] = jnp.ones((1, hidden), jnp.float32)
    p["bn2_b"] = jnp.zeros((1, hidden), jnp.float32)
    if use_lin:
        p["w_lin"], p["b_lin"] = _linear_init(
            keys[6], (NUM_SAGE_LAYERS - 1) * hidden + c_out, c_out)
    return p


def init_diffpool_params(key, dim_input, dim_hidden, dim_embedding, no_new_clusters):
    k1, k2 = jax.random.split(key)
    return {
        "gnn_pool": init_sage_params(k1, dim_input, dim_hidden, no_new_clusters, True),
        "gnn_embed": init_sage_params(k2, dim_input, dim_hidden, dim_embedding, False),
    }


# ----------------------------------------------------------------------------
# DiffPoolLayer.forward
# ----------------------------------------------------------------------------
def diffpool_layer_forward(params, x, adj, key, mask=None):
    # TODO(synk): mask handling not implemented (mask=None path only).
    K = params["gnn_pool"]["w_lin"].shape[1]
    slab = fused_sage_gnns(x, adj, params["gnn_pool"], params["gnn_embed"])
    return diffpool_and_postprocess(slab, adj, K, key)


if __name__ == "__main__":
    key = jax.random.PRNGKey(0)
    k_x, k_a, k_p, k_g = jax.random.split(key, 4)

    B, N = 2, 16
    dim_input, dim_hidden, dim_embedding = 8, 16, 16
    no_new_clusters = 8  # current_num_clusters = N; pooling_type / invariant unused

    x = jax.random.normal(k_x, (B, N, dim_input), jnp.float32)
    a = (jax.random.uniform(k_a, (B, N, N)) > 0.5).astype(jnp.float32)
    adj = jnp.maximum(a, jnp.transpose(a, (0, 2, 1)))  # symmetric dense adjacency

    params = init_diffpool_params(k_p, dim_input, dim_hidden, dim_embedding,
                                  no_new_clusters)

    fwd = jax.jit(diffpool_layer_forward)
    out_x, out_adj, link_loss, ent_loss, s = fwd(params, x, adj, k_g)
    jax.block_until_ready((out_x, out_adj, link_loss, ent_loss, s))

    assert out_x.shape == (B, no_new_clusters,
                           (NUM_SAGE_LAYERS - 1) * dim_hidden + dim_embedding)
    assert out_adj.shape == (B, no_new_clusters, no_new_clusters)
    assert s.shape == (B, N, no_new_clusters)
    print("KERNEL_OK")
</pallas_src>

<mosaic_0001>
module attributes {stable_mosaic.version = 11 : i64} {
  func.func @kernel(%arg0: memref<32x8xf32, #tpu.memory_space<vmem>>, %arg1: memref<2x16x16xf32, #tpu.memory_space<vmem>>, %arg2: memref<16x16xf32, #tpu.memory_space<vmem>>, %arg3: memref<32x16xf32, #tpu.memory_space<vmem>>, %arg4: memref<32x8xf32, #tpu.memory_space<vmem>>, %arg5: memref<40x8xf32, #tpu.memory_space<vmem>>, %arg6: memref<6x16xf32, #tpu.memory_space<vmem>>, %arg7: memref<1x8xf32, #tpu.memory_space<vmem>>, %arg8: memref<1x8xf32, #tpu.memory_space<vmem>>, %arg9: memref<16x16xf32, #tpu.memory_space<vmem>>, %arg10: memref<32x16xf32, #tpu.memory_space<vmem>>, %arg11: memref<32x16xf32, #tpu.memory_space<vmem>>, %arg12: memref<6x16xf32, #tpu.memory_space<vmem>>, %arg13: memref<1x16xf32, #tpu.memory_space<vmem>>, %arg14: memref<32x56xf32, #tpu.memory_space<vmem>>) attributes {dimension_semantics = [], scalar_prefetch = 0 : i64, scratch_operands = 0 : i64, tpu.core_type = #tpu.core_type<tc>} {
    %c0 = arith.constant 0 : index
    %c0_0 = arith.constant 0 : index
    %c0_1 = arith.constant 0 : index
    %0 = vector.load %arg1[%c0, %c0_0, %c0_1] : memref<2x16x16xf32, #tpu.memory_space<vmem>>, vector<2x16x16xf32>
    %cst = arith.constant dense<0.000000e+00> : vector<2x16xf32>
    %1 = vector.multi_reduction <add>, %0, %cst [2] : vector<2x16x16xf32> to vector<2x16xf32>
    %2 = vector.shape_cast %1 : vector<2x16xf32> to vector<2x16x1xf32>
    %cst_2 = arith.constant 1.000000e+00 : f32
    %3 = vector.broadcast %cst_2 : f32 to vector<2x16x1xf32>
    %4 = arith.maximumf %2, %3 : vector<2x16x1xf32>
    %cst_3 = arith.constant 1.000000e+00 : f32
    %5 = vector.broadcast %cst_3 : f32 to vector<2x16x1xf32>
    %6 = arith.divf %5, %4 : vector<2x16x1xf32>
    %c0_4 = arith.constant 0 : index
    %c0_5 = arith.constant 0 : index
    %7 = vector.load %arg0[%c0_4, %c0_5] : memref<32x8xf32, #tpu.memory_space<vmem>>, vector<32x8xf32>
    %8 = vector.shape_cast %7 : vector<32x8xf32> to vector<2x16x8xf32>
    "tpu.trace_start"() <{level = 10 : i32, message = "bij,bjc->bic"}> : () -> ()
    %cst_6 = arith.constant dense<0.000000e+00> : vector<2x16x8xf32>
    %9 = tpu.matmul %0, %8, %cst_6 {dimension_numbers = #tpu.dot_dimension_numbers<[2], [1], [1], [2], [0, 0, 0, 1, 1, 2], [0], [0]>} : vector<2x16x16xf32>, vector<2x16x8xf32>, vector<2x16x8xf32> -> vector<2x16x8xf32>
    "tpu.trace_stop"() : () -> ()
    %10 = vector.broadcast %6 : vector<2x16x1xf32> to vector<2x16x8xf32>
    %11 = arith.mulf %9, %10 : vector<2x16x8xf32>
    %12 = vector.shape_cast %11 : vector<2x16x8xf32> to vector<32x8xf32>
    %c0_7 = arith.constant 0 : index
    %c0_8 = arith.constant 0 : index
    %13 = vector.load %arg6[%c0_7, %c0_8] : memref<6x16xf32, #tpu.memory_space<vmem>>, vector<6x16xf32>
    %c0_9 = arith.constant 0 : index
    %c0_10 = arith.constant 0 : index
    %14 = vector.load %arg12[%c0_9, %c0_10] : memref<6x16xf32, #tpu.memory_space<vmem>>, vector<6x16xf32>
    %15 = vector.extract_strided_slice %13 {offsets = [0, 0], sizes = [1, 16], strides = [1, 1]} : vector<6x16xf32> to vector<1x16xf32>
    %16 = tpu.concatenate %12, %7 in 1 : vector<32x8xf32>, vector<32x8xf32> -> vector<32x16xf32>
    %c0_11 = arith.constant 0 : index
    %c0_12 = arith.constant 0 : index
    %17 = vector.load %arg2[%c0_11, %c0_12] : memref<16x16xf32, #tpu.memory_space<vmem>>, vector<16x16xf32>
    %cst_13 = arith.constant dense<0.000000e+00> : vector<32x16xf32>
    %18 = tpu.matmul %16, %17, %cst_13 {dimension_numbers = #tpu.dot_dimension_numbers<[1], [0], [0], [1], [0, 0, 1, 1], [], []>} : vector<32x16xf32>, vector<16x16xf32>, vector<32x16xf32> -> vector<32x16xf32>
    %19 = vector.broadcast %15 : vector<1x16xf32> to vector<32x16xf32>
    %20 = arith.addf %18, %19 : vector<32x16xf32>
    %21 = arith.mulf %20, %20 : vector<32x16xf32>
    %cst_14 = arith.constant dense<0.000000e+00> : vector<32xf32>
    %22 = vector.multi_reduction <add>, %21, %cst_14 [1] : vector<32x16xf32> to vector<32xf32>
    %23 = vector.shape_cast %22 : vector<32xf32> to vector<32x1xf32>
    %cst_15 = arith.constant 1.000000e-24 : f32
    %24 = vector.broadcast %cst_15 : f32 to vector<32x1xf32>
    %25 = arith.maximumf %23, %24 : vector<32x1xf32>
    %26 = math.rsqrt %25 : vector<32x1xf32>
    %27 = vector.broadcast %26 : vector<32x1xf32> to vector<32x16xf32>
    %28 = arith.mulf %20, %27 : vector<32x16xf32>
    %cst_16 = arith.constant 0.000000e+00 : f32
    %29 = vector.broadcast %cst_16 : f32 to vector<32x16xf32>
    %30 = arith.maximumf %28, %29 : vector<32x16xf32>
    %31 = vector.extract_strided_slice %13 {offsets = [1, 0], sizes = [1, 16], strides = [1, 1]} : vector<6x16xf32> to vector<1x16xf32>
    %32 = vector.extract_strided_slice %13 {offsets = [2, 0], sizes = [1, 16], strides = [1, 1]} : vector<6x16xf32> to vector<1x16xf32>
    %cst_17 = arith.constant dense<0.000000e+00> : vector<16xf32>
    %33 = vector.multi_reduction <add>, %30, %cst_17 [0] : vector<32x16xf32> to vector<16xf32>
    %34 = vector.shape_cast %33 : vector<16xf32> to vector<1x16xf32>
    %cst_18 = arith.constant 3.125000e-02 : f32
    %35 = vector.broadcast %cst_18 : f32 to vector<1x16xf32>
    %36 = arith.mulf %34, %35 : vector<1x16xf32>
    %37 = arith.mulf %30, %30 : vector<32x16xf32>
    %cst_19 = arith.constant dense<0.000000e+00> : vector<16xf32>
    %38 = vector.multi_reduction <add>, %37, %cst_19 [0] : vector<32x16xf32> to vector<16xf32>
    %39 = vector.shape_cast %38 : vector<16xf32> to vector<1x16xf32>
    %cst_20 = arith.constant 3.125000e-02 : f32
    %40 = vector.broadcast %cst_20 : f32 to vector<1x16xf32>
    %41 = arith.mulf %39, %40 : vector<1x16xf32>
    %42 = arith.mulf %36, %36 : vector<1x16xf32>
    %43 = arith.subf %41, %42 : vector<1x16xf32>
    %cst_21 = arith.constant 0.000000e+00 : f32
    %44 = vector.broadcast %cst_21 : f32 to vector<1x16xf32>
    %45 = arith.maximumf %43, %44 : vector<1x16xf32>
    %46 = vector.broadcast %36 : vector<1x16xf32> to vector<32x16xf32>
    %47 = arith.subf %30, %46 : vector<32x16xf32>
    %cst_22 = arith.constant 9.99999974E-6 : f32
    %48 = vector.broadcast %cst_22 : f32 to vector<1x16xf32>
    %49 = arith.addf %45, %48 : vector<1x16xf32>
    %50 = math.rsqrt %49 : vector<1x16xf32>
    %51 = vector.broadcast %50 : vector<1x16xf32> to vector<32x16xf32>
    %52 = arith.mulf %47, %51 : vector<32x16xf32>
    %53 = vector.broadcast %31 : vector<1x16xf32> to vector<32x16xf32>
    %54 = arith.mulf %52, %53 : vector<32x16xf32>
    %55 = vector.broadcast %32 : vector<1x16xf32> to vector<32x16xf32>
    %56 = arith.addf %54, %55 : vector<32x16xf32>
    %57 = vector.extract_strided_slice %14 {offsets = [0, 0], sizes = [1, 16], strides = [1, 1]} : vector<6x16xf32> to vector<1x16xf32>
    %58 = tpu.concatenate %12, %7 in 1 : vector<32x8xf32>, vector<32x8xf32> -> vector<32x16xf32>
    %c0_23 = arith.constant 0 : index
    %c0_24 = arith.constant 0 : index
    %59 = vector.load %arg9[%c0_23, %c0_24] : memref<16x16xf32, #tpu.memory_space<vmem>>, vector<16x16xf32>
    %cst_25 = arith.constant dense<0.000000e+00> : vector<32x16xf32>
    %60 = tpu.matmul %58, %59, %cst_25 {dimension_numbers = #tpu.dot_dimension_numbers<[1], [0], [0], [1], [0, 0, 1, 1], [], []>} : vector<32x16xf32>, vector<16x16xf32>, vector<32x16xf32> -> vector<32x16xf32>
    %61 = vector.broadcast %57 : vector<1x16xf32> to vector<32x16xf32>
    %62 = arith.addf %60, %61 : vector<32x16xf32>
    %63 = arith.mulf %62, %62 : vector<32x16xf32>
    %cst_26 = arith.constant dense<0.000000e+00> : vector<32xf32>
    %64 = vector.multi_reduction <add>, %63, %cst_26 [1] : vector<32x16xf32> to vector<32xf32>
    %65 = vector.shape_cast %64 : vector<32xf32> to vector<32x1xf32>
    %cst_27 = arith.constant 1.000000e-24 : f32
    %66 = vector.broadcast %cst_27 : f32 to vector<32x1xf32>
    %67 = arith.maximumf %65, %66 : vector<32x1xf32>
    %68 = math.rsqrt %67 : vector<32x1xf32>
    %69 = vector.broadcast %68 : vector<32x1xf32> to vector<32x16xf32>
    %70 = arith.mulf %62, %69 : vector<32x16xf32>
    %cst_28 = arith.constant 0.000000e+00 : f32
    %71 = vector.broadcast %cst_28 : f32 to vector<32x16xf32>
    %72 = arith.maximumf %70, %71 : vector<32x16xf32>
    %73 = vector.extract_strided_slice %14 {offsets = [1, 0], sizes = [1, 16], strides = [1, 1]} : vector<6x16xf32> to vector<1x16xf32>
    %74 = vector.extract_strided_slice %14 {offsets = [2, 0], sizes = [1, 16], strides = [1, 1]} : vector<6x16xf32> to vector<1x16xf32>
    %cst_29 = arith.constant dense<0.000000e+00> : vector<16xf32>
    %75 = vector.multi_reduction <add>, %72, %cst_29 [0] : vector<32x16xf32> to vector<16xf32>
    %76 = vector.shape_cast %75 : vector<16xf32> to vector<1x16xf32>
    %cst_30 = arith.constant 3.125000e-02 : f32
    %77 = vector.broadcast %cst_30 : f32 to vector<1x16xf32>
    %78 = arith.mulf %76, %77 : vector<1x16xf32>
    %79 = arith.mulf %72, %72 : vector<32x16xf32>
    %cst_31 = arith.constant dense<0.000000e+00> : vector<16xf32>
    %80 = vector.multi_reduction <add>, %79, %cst_31 [0] : vector<32x16xf32> to vector<16xf32>
    %81 = vector.shape_cast %80 : vector<16xf32> to vector<1x16xf32>
    %cst_32 = arith.constant 3.125000e-02 : f32
    %82 = vector.broadcast %cst_32 : f32 to vector<1x16xf32>
    %83 = arith.mulf %81, %82 : vector<1x16xf32>
    %84 = arith.mulf %78, %78 : vector<1x16xf32>
    %85 = arith.subf %83, %84 : vector<1x16xf32>
    %cst_33 = arith.constant 0.000000e+00 : f32
    %86 = vector.broadcast %cst_33 : f32 to vector<1x16xf32>
    %87 = arith.maximumf %85, %86 : vector<1x16xf32>
    %88 = vector.broadcast %78 : vector<1x16xf32> to vector<32x16xf32>
    %89 = arith.subf %72, %88 : vector<32x16xf32>
    %cst_34 = arith.constant 9.99999974E-6 : f32
    %90 = vector.broadcast %cst_34 : f32 to vector<1x16xf32>
    %91 = arith.addf %87, %90 : vector<1x16xf32>
    %92 = math.rsqrt %91 : vector<1x16xf32>
    %93 = vector.broadcast %92 : vector<1x16xf32> to vector<32x16xf32>
    %94 = arith.mulf %89, %93 : vector<32x16xf32>
    %95 = vector.broadcast %73 : vector<1x16xf32> to vector<32x16xf32>
    %96 = arith.mulf %94, %95 : vector<32x16xf32>
    %97 = vector.broadcast %74 : vector<1x16xf32> to vector<32x16xf32>
    %98 = arith.addf %96, %97 : vector<32x16xf32>
    %99 = tpu.concatenate %56, %98 in 1 : vector<32x16xf32>, vector<32x16xf32> -> vector<32x32xf32>
    %100 = vector.shape_cast %99 : vector<32x32xf32> to vector<2x16x32xf32>
    "tpu.trace_start"() <{level = 10 : i32, message = "bij,bjc->bic"}> : () -> ()
    %cst_35 = arith.constant dense<0.000000e+00> : vector<2x16x32xf32>
    %101 = tpu.matmul %0, %100, %cst_35 {dimension_numbers = #tpu.dot_dimension_numbers<[2], [1], [1], [2], [0, 0, 0, 1, 1, 2], [0], [0]>} : vector<2x16x16xf32>, vector<2x16x32xf32>, vector<2x16x32xf32> -> vector<2x16x32xf32>
    "tpu.trace_stop"() : () -> ()
    %102 = vector.broadcast %6 : vector<2x16x1xf32> to vector<2x16x32xf32>
    %103 = arith.mulf %101, %102 : vector<2x16x32xf32>
    %104 = vector.shape_cast %103 : vector<2x16x32xf32> to vector<32x32xf32>
    %105 = vector.extract_strided_slice %104 {offsets = [0, 0], sizes = [32, 16], strides = [1, 1]} : vector<32x32xf32> to vector<32x16xf32>
    %106 = vector.extract_strided_slice %13 {offsets = [3, 0], sizes = [1, 16], strides = [1, 1]} : vector<6x16xf32> to vector<1x16xf32>
    %107 = tpu.concatenate %105, %56 in 1 : vector<32x16xf32>, vector<32x16xf32> -> vector<32x32xf32>
    %c0_36 = arith.constant 0 : index
    %c0_37 = arith.constant 0 : index
    %108 = vector.load %arg3[%c0_36, %c0_37] : memref<32x16xf32, #tpu.memory_space<vmem>>, vector<32x16xf32>
    %cst_38 = arith.constant dense<0.000000e+00> : vector<32x16xf32>
    %109 = tpu.matmul %107, %108, %cst_38 {dimension_numbers = #tpu.dot_dimension_numbers<[1], [0], [0], [1], [0, 0, 1, 1], [], []>} : vector<32x32xf32>, vector<32x16xf32>, vector<32x16xf32> -> vector<32x16xf32>
    %110 = vector.broadcast %106 : vector<1x16xf32> to vector<32x16xf32>
    %111 = arith.addf %109, %110 : vector<32x16xf32>
    %112 = arith.mulf %111, %111 : vector<32x16xf32>
    %cst_39 = arith.constant dense<0.000000e+00> : vector<32xf32>
    %113 = vector.multi_reduction <add>, %112, %cst_39 [1] : vector<32x16xf32> to vector<32xf32>
    %114 = vector.shape_cast %113 : vector<32xf32> to vector<32x1xf32>
    %cst_40 = arith.constant 1.000000e-24 : f32
    %115 = vector.broadcast %cst_40 : f32 to vector<32x1xf32>
    %116 = arith.maximumf %114, %115 : vector<32x1xf32>
    %117 = math.rsqrt %116 : vector<32x1xf32>
    %118 = vector.broadcast %117 : vector<32x1xf32> to vector<32x16xf32>
    %119 = arith.mulf %111, %118 : vector<32x16xf32>
    %cst_41 = arith.constant 0.000000e+00 : f32
    %120 = vector.broadcast %cst_41 : f32 to vector<32x16xf32>
    %121 = arith.maximumf %119, %120 : vector<32x16xf32>
    %122 = vector.extract_strided_slice %13 {offsets = [4, 0], sizes = [1, 16], strides = [1, 1]} : vector<6x16xf32> to vector<1x16xf32>
    %123 = vector.extract_strided_slice %13 {offsets = [5, 0], sizes = [1, 16], strides = [1, 1]} : vector<6x16xf32> to vector<1x16xf32>
    %cst_42 = arith.constant dense<0.000000e+00> : vector<16xf32>
    %124 = vector.multi_reduction <add>, %121, %cst_42 [0] : vector<32x16xf32> to vector<16xf32>
    %125 = vector.shape_cast %124 : vector<16xf32> to vector<1x16xf32>
    %cst_43 = arith.constant 3.125000e-02 : f32
    %126 = vector.broadcast %cst_43 : f32 to vector<1x16xf32>
    %127 = arith.mulf %125, %126 : vector<1x16xf32>
    %128 = arith.mulf %121, %121 : vector<32x16xf32>
    %cst_44 = arith.constant dense<0.000000e+00> : vector<16xf32>
    %129 = vector.multi_reduction <add>, %128, %cst_44 [0] : vector<32x16xf32> to vector<16xf32>
    %130 = vector.shape_cast %129 : vector<16xf32> to vector<1x16xf32>
    %cst_45 = arith.constant 3.125000e-02 : f32
    %131 = vector.broadcast %cst_45 : f32 to vector<1x16xf32>
    %132 = arith.mulf %130, %131 : vector<1x16xf32>
    %133 = arith.mulf %127, %127 : vector<1x16xf32>
    %134 = arith.subf %132, %133 : vector<1x16xf32>
    %cst_46 = arith.constant 0.000000e+00 : f32
    %135 = vector.broadcast %cst_46 : f32 to vector<1x16xf32>
    %136 = arith.maximumf %134, %135 : vector<1x16xf32>
    %137 = vector.broadcast %127 : vector<1x16xf32> to vector<32x16xf32>
    %138 = arith.subf %121, %137 : vector<32x16xf32>
    %cst_47 = arith.constant 9.99999974E-6 : f32
    %139 = vector.broadcast %cst_47 : f32 to vector<1x16xf32>
    %140 = arith.addf %136, %139 : vector<1x16xf32>
    %141 = math.rsqrt %140 : vector<1x16xf32>
    %142 = vector.broadcast %141 : vector<1x16xf32> to vector<32x16xf32>
    %143 = arith.mulf %138, %142 : vector<32x16xf32>
    %144 = vector.broadcast %122 : vector<1x16xf32> to vector<32x16xf32>
    %145 = arith.mulf %143, %144 : vector<32x16xf32>
    %146 = vector.broadcast %123 : vector<1x16xf32> to vector<32x16xf32>
    %147 = arith.addf %145, %146 : vector<32x16xf32>
    %148 = vector.extract_strided_slice %104 {offsets = [0, 16], sizes = [32, 16], strides = [1, 1]} : vector<32x32xf32> to vector<32x16xf32>
    %149 = vector.extract_strided_slice %14 {offsets = [3, 0], sizes = [1, 16], strides = [1, 1]} : vector<6x16xf32> to vector<1x16xf32>
    %150 = tpu.concatenate %148, %98 in 1 : vector<32x16xf32>, vector<32x16xf32> -> vector<32x32xf32>
    %c0_48 = arith.constant 0 : index
    %c0_49 = arith.constant 0 : index
    %151 = vector.load %arg10[%c0_48, %c0_49] : memref<32x16xf32, #tpu.memory_space<vmem>>, vector<32x16xf32>
    %cst_50 = arith.constant dense<0.000000e+00> : vector<32x16xf32>
    %152 = tpu.matmul %150, %151, %cst_50 {dimension_numbers = #tpu.dot_dimension_numbers<[1], [0], [0], [1], [0, 0, 1, 1], [], []>} : vector<32x32xf32>, vector<32x16xf32>, vector<32x16xf32> -> vector<32x16xf32>
    %153 = vector.broadcast %149 : vector<1x16xf32> to vector<32x16xf32>
    %154 = arith.addf %152, %153 : vector<32x16xf32>
    %155 = arith.mulf %154, %154 : vector<32x16xf32>
    %cst_51 = arith.constant dense<0.000000e+00> : vector<32xf32>
    %156 = vector.multi_reduction <add>, %155, %cst_51 [1] : vector<32x16xf32> to vector<32xf32>
    %157 = vector.shape_cast %156 : vector<32xf32> to vector<32x1xf32>
    %cst_52 = arith.constant 1.000000e-24 : f32
    %158 = vector.broadcast %cst_52 : f32 to vector<32x1xf32>
    %159 = arith.maximumf %157, %158 : vector<32x1xf32>
    %160 = math.rsqrt %159 : vector<32x1xf32>
    %161 = vector.broadcast %160 : vector<32x1xf32> to vector<32x16xf32>
    %162 = arith.mulf %154, %161 : vector<32x16xf32>
    %cst_53 = arith.constant 0.000000e+00 : f32
    %163 = vector.broadcast %cst_53 : f32 to vector<32x16xf32>
    %164 = arith.maximumf %162, %163 : vector<32x16xf32>
    %165 = vector.extract_strided_slice %14 {offsets = [4, 0], sizes = [1, 16], strides = [1, 1]} : vector<6x16xf32> to vector<1x16xf32>
    %166 = vector.extract_strided_slice %14 {offsets = [5, 0], sizes = [1, 16], strides = [1, 1]} : vector<6x16xf32> to vector<1x16xf32>
    %cst_54 = arith.constant dense<0.000000e+00> : vector<16xf32>
    %167 = vector.multi_reduction <add>, %164, %cst_54 [0] : vector<32x16xf32> to vector<16xf32>
    %168 = vector.shape_cast %167 : vector<16xf32> to vector<1x16xf32>
    %cst_55 = arith.constant 3.125000e-02 : f32
    %169 = vector.broadcast %cst_55 : f32 to vector<1x16xf32>
    %170 = arith.mulf %168, %169 : vector<1x16xf32>
    %171 = arith.mulf %164, %164 : vector<32x16xf32>
    %cst_56 = arith.constant dense<0.000000e+00> : vector<16xf32>
    %172 = vector.multi_reduction <add>, %171, %cst_56 [0] : vector<32x16xf32> to vector<16xf32>
    %173 = vector.shape_cast %172 : vector<16xf32> to vector<1x16xf32>
    %cst_57 = arith.constant 3.125000e-02 : f32
    %174 = vector.broadcast %cst_57 : f32 to vector<1x16xf32>
    %175 = arith.mulf %173, %174 : vector<1x16xf32>
    %176 = arith.mulf %170, %170 : vector<1x16xf32>
    %177 = arith.subf %175, %176 : vector<1x16xf32>
    %cst_58 = arith.constant 0.000000e+00 : f32
    %178 = vector.broadcast %cst_58 : f32 to vector<1x16xf32>
    %179 = arith.maximumf %177, %178 : vector<1x16xf32>
    %180 = vector.broadcast %170 : vector<1x16xf32> to vector<32x16xf32>
    %181 = arith.subf %164, %180 : vector<32x16xf32>
    %cst_59 = arith.constant 9.99999974E-6 : f32
    %182 = vector.broadcast %cst_59 : f32 to vector<1x16xf32>
    %183 = arith.addf %179, %182 : vector<1x16xf32>
    %184 = math.rsqrt %183 : vector<1x16xf32>
    %185 = vector.broadcast %184 : vector<1x16xf32> to vector<32x16xf32>
    %186 = arith.mulf %181, %185 : vector<32x16xf32>
    %187 = vector.broadcast %165 : vector<1x16xf32> to vector<32x16xf32>
    %188 = arith.mulf %186, %187 : vector<32x16xf32>
    %189 = vector.broadcast %166 : vector<1x16xf32> to vector<32x16xf32>
    %190 = arith.addf %188, %189 : vector<32x16xf32>
    %191 = tpu.concatenate %147, %190 in 1 : vector<32x16xf32>, vector<32x16xf32> -> vector<32x32xf32>
    %192 = vector.shape_cast %191 : vector<32x32xf32> to vector<2x16x32xf32>
    "tpu.trace_start"() <{level = 10 : i32, message = "bij,bjc->bic"}> : () -> ()
    %cst_60 = arith.constant dense<0.000000e+00> : vector<2x16x32xf32>
    %193 = tpu.matmul %0, %192, %cst_60 {dimension_numbers = #tpu.dot_dimension_numbers<[2], [1], [1], [2], [0, 0, 0, 1, 1, 2], [0], [0]>} : vector<2x16x16xf32>, vector<2x16x32xf32>, vector<2x16x32xf32> -> vector<2x16x32xf32>
    "tpu.trace_stop"() : () -> ()
    %194 = vector.broadcast %6 : vector<2x16x1xf32> to vector<2x16x32xf32>
    %195 = arith.mulf %193, %194 : vector<2x16x32xf32>
    %196 = vector.shape_cast %195 : vector<2x16x32xf32> to vector<32x32xf32>
    %197 = vector.extract_strided_slice %196 {offsets = [0, 0], sizes = [32, 16], strides = [1, 1]} : vector<32x32xf32> to vector<32x16xf32>
    %c0_61 = arith.constant 0 : index
    %c0_62 = arith.constant 0 : index
    %198 = vector.load %arg7[%c0_61, %c0_62] : memref<1x8xf32, #tpu.memory_space<vmem>>, vector<1x8xf32>
    %199 = tpu.concatenate %197, %147 in 1 : vector<32x16xf32>, vector<32x16xf32> -> vector<32x32xf32>
    %c0_63 = arith.constant 0 : index
    %c0_64 = arith.constant 0 : index
    %200 = vector.load %arg4[%c0_63, %c0_64] : memref<32x8xf32, #tpu.memory_space<vmem>>, vector<32x8xf32>
    %cst_65 = arith.constant dense<0.000000e+00> : vector<32x8xf32>
    %201 = tpu.matmul %199, %200, %cst_65 {dimension_numbers = #tpu.dot_dimension_numbers<[1], [0], [0], [1], [0, 0, 1, 1], [], []>} : vector<32x32xf32>, vector<32x8xf32>, vector<32x8xf32> -> vector<32x8xf32>
    %202 = vector.broadcast %198 : vector<1x8xf32> to vector<32x8xf32>
    %203 = arith.addf %201, %202 : vector<32x8xf32>
    %204 = arith.mulf %203, %203 : vector<32x8xf32>
    %cst_66 = arith.constant dense<0.000000e+00> : vector<32xf32>
    %205 = vector.multi_reduction <add>, %204, %cst_66 [1] : vector<32x8xf32> to vector<32xf32>
    %206 = vector.shape_cast %205 : vector<32xf32> to vector<32x1xf32>
    %cst_67 = arith.constant 1.000000e-24 : f32
    %207 = vector.broadcast %cst_67 : f32 to vector<32x1xf32>
    %208 = arith.maximumf %206, %207 : vector<32x1xf32>
    %209 = math.rsqrt %208 : vector<32x1xf32>
    %210 = vector.broadcast %209 : vector<32x1xf32> to vector<32x8xf32>
    %211 = arith.mulf %203, %210 : vector<32x8xf32>
    %212 = vector.extract_strided_slice %196 {offsets = [0, 16], sizes = [32, 16], strides = [1, 1]} : vector<32x32xf32> to vector<32x16xf32>
    %c0_68 = arith.constant 0 : index
    %c0_69 = arith.constant 0 : index
    %213 = vector.load %arg13[%c0_68, %c0_69] : memref<1x16xf32, #tpu.memory_space<vmem>>, vector<1x16xf32>
    %214 = tpu.concatenate %212, %190 in 1 : vector<32x16xf32>, vector<32x16xf32> -> vector<32x32xf32>
    %c0_70 = arith.constant 0 : index
    %c0_71 = arith.constant 0 : index
    %215 = vector.load %arg11[%c0_70, %c0_71] : memref<32x16xf32, #tpu.memory_space<vmem>>, vector<32x16xf32>
    %cst_72 = arith.constant dense<0.000000e+00> : vector<32x16xf32>
    %216 = tpu.matmul %214, %215, %cst_72 {dimension_numbers = #tpu.dot_dimension_numbers<[1], [0], [0], [1], [0, 0, 1, 1], [], []>} : vector<32x32xf32>, vector<32x16xf32>, vector<32x16xf32> -> vector<32x16xf32>
    %217 = vector.broadcast %213 : vector<1x16xf32> to vector<32x16xf32>
    %218 = arith.addf %216, %217 : vector<32x16xf32>
    %219 = arith.mulf %218, %218 : vector<32x16xf32>
    %cst_73 = arith.constant dense<0.000000e+00> : vector<32xf32>
    %220 = vector.multi_reduction <add>, %219, %cst_73 [1] : vector<32x16xf32> to vector<32xf32>
    %221 = vector.shape_cast %220 : vector<32xf32> to vector<32x1xf32>
    %cst_74 = arith.constant 1.000000e-24 : f32
    %222 = vector.broadcast %cst_74 : f32 to vector<32x1xf32>
    %223 = arith.maximumf %221, %222 : vector<32x1xf32>
    %224 = math.rsqrt %223 : vector<32x1xf32>
    %225 = vector.broadcast %224 : vector<32x1xf32> to vector<32x16xf32>
    %226 = arith.mulf %218, %225 : vector<32x16xf32>
    %227 = tpu.concatenate %56, %147, %211 in 1 : vector<32x16xf32>, vector<32x16xf32>, vector<32x8xf32> -> vector<32x40xf32>
    %c0_75 = arith.constant 0 : index
    %c0_76 = arith.constant 0 : index
    %228 = vector.load %arg5[%c0_75, %c0_76] : memref<40x8xf32, #tpu.memory_space<vmem>>, vector<40x8xf32>
    %cst_77 = arith.constant dense<0.000000e+00> : vector<32x8xf32>
    %229 = tpu.matmul %227, %228, %cst_77 {dimension_numbers = #tpu.dot_dimension_numbers<[1], [0], [0], [1], [0, 0, 1, 1], [], []>} : vector<32x40xf32>, vector<40x8xf32>, vector<32x8xf32> -> vector<32x8xf32>
    %c0_78 = arith.constant 0 : index
    %c0_79 = arith.constant 0 : index
    %230 = vector.load %arg8[%c0_78, %c0_79] : memref<1x8xf32, #tpu.memory_space<vmem>>, vector<1x8xf32>
    %231 = vector.broadcast %230 : vector<1x8xf32> to vector<32x8xf32>
    %232 = arith.addf %229, %231 : vector<32x8xf32>
    %233 = tpu.concatenate %232, %98, %190, %226 in 1 : vector<32x8xf32>, vector<32x16xf32>, vector<32x16xf32>, vector<32x16xf32> -> vector<32x56xf32>
    %c0_80 = arith.constant 0 : index
    %c0_81 = arith.constant 0 : index
    %234 = vector.load %arg14[%c0_80, %c0_81] : memref<32x56xf32, #tpu.memory_space<vmem>>, vector<32x56xf32>
    tpu.vector_store %arg14[%c0_80, %c0_81], %233 {strides = array<i32>} : memref<32x56xf32, #tpu.memory_space<vmem>>, vector<32x56xf32>,
    return
  }
}

module attributes {stable_mosaic.version = 11 : i64} {
  func.func @kernel(%arg0: i32, %arg1: memref<1x16x56xf32, #tpu.memory_space<vmem>>, %arg2: memref<1x16x16xf32, #tpu.memory_space<vmem>>, %arg3: memref<1x8x8xf32, #tpu.memory_space<vmem>>, %arg4: memref<1x8x48xf32, #tpu.memory_space<vmem>>, %arg5: memref<1x8x8xf32, #tpu.memory_space<vmem>>, %arg6: memref<1x16x8xf32, #tpu.memory_space<vmem>>, %arg7: memref<1x1x1xf32, #tpu.memory_space<vmem>>, %arg8: memref<1x1x1xf32, #tpu.memory_space<vmem>>) attributes {dimension_semantics = [#tpu.dimension_semantics<parallel>], iteration_bounds = array<i64: 2>, scalar_prefetch = 0 : i64, scratch_operands = 0 : i64, tpu.core_type = #tpu.core_type<tc>, window_params = [{transform_indices = @transform_0, window_bounds = array<i64: 1, 16, 56>}, {transform_indices = @transform_1, window_bounds = array<i64: 1, 16, 16>}, {transform_indices = @transform_2, window_bounds = array<i64: 1, 8, 8>}, {transform_indices = @transform_3, window_bounds = array<i64: 1, 8, 48>}, {transform_indices = @transform_4, window_bounds = array<i64: 1, 8, 8>}, {transform_indices = @transform_5, window_bounds = array<i64: 1, 16, 8>}, {transform_indices = @transform_6, window_bounds = array<i64: 1, 1, 1>}, {transform_indices = @transform_7, window_bounds = array<i64: 1, 1, 1>}]} {
    %c0 = arith.constant 0 : index
    %c0_0 = arith.constant 0 : index
    %c0_1 = arith.constant 0 : index
    %0 = vector.load %arg1[%c0, %c0_0, %c0_1] : memref<1x16x56xf32, #tpu.memory_space<vmem>>, vector<1x16x56xf32>
    %1 = vector.shape_cast %0 : vector<1x16x56xf32> to vector<16x56xf32>
    %c0_2 = arith.constant 0 : index
    %c0_3 = arith.constant 0 : index
    %c0_4 = arith.constant 0 : index
    %2 = vector.load %arg2[%c0_2, %c0_3, %c0_4] : memref<1x16x16xf32, #tpu.memory_space<vmem>>, vector<1x16x16xf32>
    %3 = vector.shape_cast %2 : vector<1x16x16xf32> to vector<16x16xf32>
    %4 = vector.extract_strided_slice %1 {offsets = [0, 0], sizes = [16, 8], strides = [1, 1]} : vector<16x56xf32> to vector<16x8xf32>
    %5 = vector.extract_strided_slice %1 {offsets = [0, 8], sizes = [16, 48], strides = [1, 1]} : vector<16x56xf32> to vector<16x48xf32>
    %cst = arith.constant dense<0xFF800000> : vector<16xf32>
    %6 = vector.multi_reduction <maximumf>, %4, %cst [1] : vector<16x8xf32> to vector<16xf32>
    %7 = vector.shape_cast %6 : vector<16xf32> to vector<16x1xf32>
    %8 = vector.broadcast %7 : vector<16x1xf32> to vector<16x8xf32>
    %9 = arith.subf %4, %8 : vector<16x8xf32>
    %10 = math.exp %9 : vector<16x8xf32>
    %cst_5 = arith.constant dense<0.000000e+00> : vector<16xf32>
    %11 = vector.multi_reduction <add>, %10, %cst_5 [1] : vector<16x8xf32> to vector<16xf32>
    %12 = vector.shape_cast %11 : vector<16xf32> to vector<16x1xf32>
    %13 = vector.broadcast %12 : vector<16x1xf32> to vector<16x8xf32>
    %14 = arith.divf %10, %13 : vector<16x8xf32>
    %c0_6 = arith.constant 0 : index
    %c0_7 = arith.constant 0 : index
    %c0_8 = arith.constant 0 : index
    %15 = vector.load %arg6[%c0_6, %c0_7, %c0_8] : memref<1x16x8xf32, #tpu.memory_space<vmem>>, vector<1x16x8xf32>
    %16 = vector.shape_cast %15 : vector<1x16x8xf32> to vector<16x8xf32>
    %17 = vector.shape_cast %14 : vector<16x8xf32> to vector<1x16x8xf32>
    tpu.vector_store %arg6[%c0_6, %c0_7, %c0_8], %17 {strides = array<i32>} : memref<1x16x8xf32, #tpu.memory_space<vmem>>, vector<1x16x8xf32>,
    %cst_9 = arith.constant dense<0.000000e+00> : vector<8x48xf32>
    %18 = tpu.matmul %14, %5, %cst_9 {dimension_numbers = #tpu.dot_dimension_numbers<[0], [0], [1], [1], [0, 1, 1, 1], [], []>} : vector<16x8xf32>, vector<16x48xf32>, vector<8x48xf32> -> vector<8x48xf32>
    %c0_10 = arith.constant 0 : index
    %c0_11 = arith.constant 0 : index
    %c0_12 = arith.constant 0 : index
    %19 = vector.load %arg4[%c0_10, %c0_11, %c0_12] : memref<1x8x48xf32, #tpu.memory_space<vmem>>, vector<1x8x48xf32>
    %20 = vector.shape_cast %19 : vector<1x8x48xf32> to vector<8x48xf32>
    %21 = vector.shape_cast %18 : vector<8x48xf32> to vector<1x8x48xf32>
    tpu.vector_store %arg4[%c0_10, %c0_11, %c0_12], %21 {strides = array<i32>} : memref<1x8x48xf32, #tpu.memory_space<vmem>>, vector<1x8x48xf32>,
    %cst_13 = arith.constant dense<0.000000e+00> : vector<8x16xf32>
    %22 = tpu.matmul %14, %3, %cst_13 {dimension_numbers = #tpu.dot_dimension_numbers<[0], [0], [1], [1], [0, 1, 1, 1], [], []>} : vector<16x8xf32>, vector<16x16xf32>, vector<8x16xf32> -> vector<8x16xf32>
    %cst_14 = arith.constant dense<0.000000e+00> : vector<8x8xf32>
    %23 = tpu.matmul %22, %14, %cst_14 {dimension_numbers = #tpu.dot_dimension_numbers<[1], [0], [0], [1], [0, 0, 1, 1], [], []>} : vector<8x16xf32>, vector<16x8xf32>, vector<8x8xf32> -> vector<8x8xf32>
    %cst_15 = arith.constant dense<0.000000e+00> : vector<8x8xf32>
    %24 = tpu.matmul %14, %14, %cst_15 {dimension_numbers = #tpu.dot_dimension_numbers<[0], [0], [1], [1], [0, 1, 1, 1], [], []>} : vector<16x8xf32>, vector<16x8xf32>, vector<8x8xf32> -> vector<8x8xf32>
    %25 = tpu.iota {dimensions = array<i32: 0>} : vector<8x8xi32>
    %26 = tpu.iota {dimensions = array<i32: 1>} : vector<8x8xi32>
    %27 = arith.cmpi eq, %25, %26 : vector<8x8xi32>
    %28 = arith.mulf %3, %3 : vector<16x16xf32>
    %cst_16 = arith.constant dense<0.000000e+00> : vector<16xf32>
    %29 = vector.multi_reduction <add>, %28, %cst_16 [1] : vector<16x16xf32> to vector<16xf32>
    %30 = vector.shape_cast %29 : vector<16xf32> to vector<16x1xf32>
    %cst_17 = arith.constant dense<0.000000e+00> : vector<1xf32>
    %31 = vector.multi_reduction <add>, %30, %cst_17 [0] : vector<16x1xf32> to vector<1xf32>
    %32 = vector.shape_cast %31 : vector<1xf32> to vector<1x1xf32>
    %cst_18 = arith.constant 0.000000e+00 : f32
    %33 = vector.broadcast %cst_18 : f32 to vector<8x8xf32>
    %34 = arith.select %27, %23, %33 : vector<8x8xi1>, vector<8x8xf32>
    %cst_19 = arith.constant dense<0.000000e+00> : vector<8xf32>
    %35 = vector.multi_reduction <add>, %34, %cst_19 [1] : vector<8x8xf32> to vector<8xf32>
    %36 = vector.shape_cast %35 : vector<8xf32> to vector<8x1xf32>
    %cst_20 = arith.constant dense<0.000000e+00> : vector<1xf32>
    %37 = vector.multi_reduction <add>, %36, %cst_20 [0] : vector<8x1xf32> to vector<1xf32>
    %38 = vector.shape_cast %37 : vector<1xf32> to vector<1x1xf32>
    %39 = arith.mulf %24, %24 : vector<8x8xf32>
    %cst_21 = arith.constant dense<0.000000e+00> : vector<8xf32>
    %40 = vector.multi_reduction <add>, %39, %cst_21 [1] : vector<8x8xf32> to vector<8xf32>
    %41 = vector.shape_cast %40 : vector<8xf32> to vector<8x1xf32>
    %cst_22 = arith.constant dense<0.000000e+00> : vector<1xf32>
    %42 = vector.multi_reduction <add>, %41, %cst_22 [0] : vector<8x1xf32> to vector<1xf32>
    %43 = vector.shape_cast %42 : vector<1xf32> to vector<1x1xf32>
    %cst_23 = arith.constant 2.000000e+00 : f32
    %44 = vector.broadcast %cst_23 : f32 to vector<1x1xf32>
    %45 = arith.mulf %44, %38 : vector<1x1xf32>
    %46 = arith.subf %32, %45 : vector<1x1xf32>
    %47 = arith.addf %46, %43 : vector<1x1xf32>
    %c0_24 = arith.constant 0 : index
    %c0_25 = arith.constant 0 : index
    %c0_26 = arith.constant 0 : index
    %48 = vector.load %arg7[%c0_24, %c0_25, %c0_26] : memref<1x1x1xf32, #tpu.memory_space<vmem>>, vector<1x1x1xf32>
    %49 = vector.shape_cast %48 : vector<1x1x1xf32> to vector<1x1xf32>
    %50 = vector.shape_cast %47 : vector<1x1xf32> to vector<1x1x1xf32>
    tpu.vector_store %arg7[%c0_24, %c0_25, %c0_26], %50 {strides = array<i32>} : memref<1x1x1xf32, #tpu.memory_space<vmem>>, vector<1x1x1xf32>,
    %cst_27 = arith.constant 0.000000e+00 : f32
    %51 = vector.broadcast %cst_27 : f32 to vector<16x8xf32>
    %52 = arith.subf %51, %14 : vector<16x8xf32>
    %cst_28 = arith.constant 1.000000e-15 : f32
    %53 = vector.broadcast %cst_28 : f32 to vector<16x8xf32>
    %54 = arith.addf %14, %53 : vector<16x8xf32>
    %55 = math.log %54 : vector<16x8xf32>
    %56 = arith.mulf %52, %55 : vector<16x8xf32>
    %cst_29 = arith.constant dense<0.000000e+00> : vector<16xf32>
    %57 = vector.multi_reduction <add>, %56, %cst_29 [1] : vector<16x8xf32> to vector<16xf32>
    %58 = vector.shape_cast %57 : vector<16xf32> to vector<16x1xf32>
    %cst_30 = arith.constant dense<0.000000e+00> : vector<1xf32>
    %59 = vector.multi_reduction <add>, %58, %cst_30 [0] : vector<16x1xf32> to vector<1xf32>
    %60 = vector.shape_cast %59 : vector<1xf32> to vector<1x1xf32>
    %c0_31 = arith.constant 0 : index
    %c0_32 = arith.constant 0 : index
    %c0_33 = arith.constant 0 : index
    %61 = vector.load %arg8[%c0_31, %c0_32, %c0_33] : memref<1x1x1xf32, #tpu.memory_space<vmem>>, vector<1x1x1xf32>
    %62 = vector.shape_cast %61 : vector<1x1x1xf32> to vector<1x1xf32>
    %63 = vector.shape_cast %60 : vector<1x1xf32> to vector<1x1x1xf32>
    tpu.vector_store %arg8[%c0_31, %c0_32, %c0_33], %63 {strides = array<i32>} : memref<1x1x1xf32, #tpu.memory_space<vmem>>, vector<1x1x1xf32>,
    %cst_34 = arith.constant dense<0x7F800000> : vector<8xf32>
    %64 = vector.multi_reduction <minimumf>, %23, %cst_34 [1] : vector<8x8xf32> to vector<8xf32>
    %65 = vector.shape_cast %64 : vector<8xf32> to vector<8x1xf32>
    %cst_35 = arith.constant dense<0x7F800000> : vector<1xf32>
    %66 = vector.multi_reduction <minimumf>, %65, %cst_35 [0] : vector<8x1xf32> to vector<1xf32>
    %67 = vector.shape_cast %66 : vector<1xf32> to vector<1x1xf32>
    %cst_36 = arith.constant dense<0xFF800000> : vector<8xf32>
    %68 = vector.multi_reduction <maximumf>, %23, %cst_36 [1] : vector<8x8xf32> to vector<8xf32>
    %69 = vector.shape_cast %68 : vector<8xf32> to vector<8x1xf32>
    %cst_37 = arith.constant dense<0xFF800000> : vector<1xf32>
    %70 = vector.multi_reduction <maximumf>, %69, %cst_37 [0] : vector<8x1xf32> to vector<1xf32>
    %71 = vector.shape_cast %70 : vector<1xf32> to vector<1x1xf32>
    %72 = vector.broadcast %67 : vector<1x1xf32> to vector<8x8xf32>
    %73 = arith.subf %23, %72 : vector<8x8xf32>
    %74 = arith.subf %71, %67 : vector<1x1xf32>
    %cst_38 = arith.constant 9.99999996E-13 : f32
    %75 = vector.broadcast %cst_38 : f32 to vector<1x1xf32>
    %76 = arith.maximumf %74, %75 : vector<1x1xf32>
    %77 = vector.broadcast %76 : vector<1x1xf32> to vector<8x8xf32>
    %78 = arith.divf %73, %77 : vector<8x8xf32>
    %c0_39 = arith.constant 0 : index
    %c0_40 = arith.constant 0 : index
    %c0_41 = arith.constant 0 : index
    %79 = vector.load %arg3[%c0_39, %c0_40, %c0_41] : memref<1x8x8xf32, #tpu.memory_space<vmem>>, vector<1x8x8xf32>
    %80 = vector.shape_cast %79 : vector<1x8x8xf32> to vector<8x8xf32>
    %81 = arith.addf %78, %80 : vector<8x8xf32>
    %cst_42 = arith.constant 1.000000e+00 : f32
    %82 = vector.broadcast %cst_42 : f32 to vector<8x8xf32>
    %83 = arith.subf %82, %78 : vector<8x8xf32>
    %84 = arith.cmpf oge, %81, %83 : vector<8x8xf32>
    %cst_43 = arith.constant 1.000000e+00 : f32
    %cst_44 = arith.constant 0.000000e+00 : f32
    %85 = vector.broadcast %cst_43 : f32 to vector<8x8xf32>
    %86 = vector.broadcast %cst_44 : f32 to vector<8x8xf32>
    %87 = arith.select %84, %85, %86 : vector<8x8xi1>, vector<8x8xf32>
    %88 = arith.cmpi sge, %26, %25 : vector<8x8xi32>
    %cst_45 = arith.constant 0.000000e+00 : f32
    %89 = vector.broadcast %cst_45 : f32 to vector<8x8xf32>
    %90 = arith.select %88, %87, %89 : vector<8x8xi1>, vector<8x8xf32>
    %91 = tpu.transpose %90, [1, 0] : vector<8x8xf32> -> vector<8x8xf32>
    %92 = arith.addf %90, %91 : vector<8x8xf32>
    %cst_46 = arith.constant 1.000000e+00 : f32
    %93 = vector.broadcast %cst_46 : f32 to vector<8x8xf32>
    %94 = arith.select %27, %93, %92 : vector<8x8xi1>, vector<8x8xf32>
    %c0_47 = arith.constant 0 : index
    %c0_48 = arith.constant 0 : index
    %c0_49 = arith.constant 0 : index
    %95 = vector.load %arg5[%c0_47, %c0_48, %c0_49] : memref<1x8x8xf32, #tpu.memory_space<vmem>>, vector<1x8x8xf32>
    %96 = vector.shape_cast %95 : vector<1x8x8xf32> to vector<8x8xf32>
    %97 = vector.shape_cast %94 : vector<8x8xf32> to vector<1x8x8xf32>
    tpu.vector_store %arg5[%c0_47, %c0_48, %c0_49], %97 {strides = array<i32>} : memref<1x8x8xf32, #tpu.memory_space<vmem>>, vector<1x8x8xf32>,
    return
  }
  func.func @transform_0(%arg0: i32) -> (i32, i32, i32) {
    %c0_i32 = arith.constant 0 : i32
    %c0_i32_0 = arith.constant 0 : i32
    %c0_i32_1 = arith.constant 0 : i32
    return %arg0, %c0_i32, %c0_i32_0 : i32, i32, i32
  }
  func.func @transform_1(%arg0: i32) -> (i32, i32, i32) {
    %c0_i32 = arith.constant 0 : i32
    %c0_i32_0 = arith.constant 0 : i32
    %c0_i32_1 = arith.constant 0 : i32
    return %arg0, %c0_i32, %c0_i32_0 : i32, i32, i32
  }
  func.func @transform_2(%arg0: i32) -> (i32, i32, i32) {
    %c0_i32 = arith.constant 0 : i32
    %c0_i32_0 = arith.constant 0 : i32
    %c0_i32_1 = arith.constant 0 : i32
    return %arg0, %c0_i32, %c0_i32_0 : i32, i32, i32
  }
  func.func @transform_3(%arg0: i32) -> (i32, i32, i32) {
    %c0_i32 = arith.constant 0 : i32
    %c0_i32_0 = arith.constant 0 : i32
    %c0_i32_1 = arith.constant 0 : i32
    return %arg0, %c0_i32, %c0_i32_0 : i32, i32, i32
  }
  func.func @transform_4(%arg0: i32) -> (i32, i32, i32) {
    %c0_i32 = arith.constant 0 : i32
    %c0_i32_0 = arith.constant 0 : i32
    %c0_i32_1 = arith.constant 0 : i32
    return %arg0, %c0_i32, %c0_i32_0 : i32, i32, i32
  }
  func.func @transform_5(%arg0: i32) -> (i32, i32, i32) {
    %c0_i32 = arith.constant 0 : i32
    %c0_i32_0 = arith.constant 0 : i32
    %c0_i32_1 = arith.constant 0 : i32
    return %arg0, %c0_i32, %c0_i32_0 : i32, i32, i32
  }
  func.func @transform_6(%arg0: i32) -> (i32, i32, i32) {
    %c0_i32 = arith.constant 0 : i32
    %c0_i32_0 = arith.constant 0 : i32
    %c0_i32_1 = arith.constant 0 : i32
    return %arg0, %c0_i32, %c0_i32_0 : i32, i32, i32
  }
  func.func @transform_7(%arg0: i32) -> (i32, i32, i32) {
    %c0_i32 = arith.constant 0 : i32
    %c0_i32_0 = arith.constant 0 : i32
    %c0_i32_1 = arith.constant 0 : i32
    return %arg0, %c0_i32, %c0_i32_0 : i32, i32, i32
  }
}

</mosaic_0001>

<bundles_post_ra>
// kernel: diffpool_layer_forward.3
= control target key start
LH: loop header
LB: loop body
LE: loop exit
PB: predicated region body
PF: predicated region fallthrough
CT: control target
= control target key end

     0   :  { %s1593_s0 = inlined_call_operand.vmem [shape: f32[2,16,56], index: 0, kind: input, shape index: {}]   ;;  %s1594_s1 = inlined_call_operand.vmem [shape: f32[2,16,16], index: 1, kind: input, shape index: {}]   ;;  %s1595_s2 = inlined_call_operand.vmem [shape: f32[2,8,8], index: 2, kind: input, shape index: {}]   ;;  %s1596_s3 = inlined_call_operand.hbm [shape: f32[2,8,48], index: 3, kind: output, shape index: {0}]   ;;  %s1597_s4 = inlined_call_operand.hbm [shape: f32[2,8,8], index: 4, kind: output, shape index: {1}]   ;;  %s1598_s5 = inlined_call_operand.vmem [shape: f32[2,16,8], index: 5, kind: output, shape index: {2}]   ;;  %s1599_s6 = inlined_call_operand.vmem [shape: f32[2,1,1], index: 6, kind: output, shape index: {3}]   ;;  %s1600_s7 = inlined_call_operand.vmem [shape: f32[2,1,1], index: 7, kind: output, shape index: {4}]  }
   0x1   :  { %1603 = sst [smem:[#allocation8_spill]] %s1593_s0 }
   0x2   :  { %13 = vsyncpa [#allocation3], 0 }
   0x3   :  { %15 = vsyncpa [#allocation3 + $0x1], 0 }
   0x4   :  { %16 = vsyncpa [#allocation5], 0 }
   0x5   :  { %18 = vsyncpa [#allocation5 + $0x1], 0  ;;  %s1362_s24 = smov 0   ;;  %s1364_s25 = smov 0  }
   0x6   :  { %s1366_s26 = smov 0   ;;  %s1368_s27 = smov 0  }
   0x7 LB: > { %s1383_s28 = sadd.s32 4294967295, %s1314_s27   ;;  %s1075_s29 = sadd.s32 4294967294, %s1314_s27   ;;  %s1314_s27 = sphi %s1368_s27, %s1612_s27   ;;  %s1310_s26 = sphi %s1366_s26, %s1611_s26   ;;  %s1306_s25 = sphi %s1364_s25, %s1610_s25   ;;  %s1302_s24 = sphi %s1362_s24, %s1609_s24  }
   0x8   : > { %s1387_s30 = sadd.s32 1, %s1314_s27   ;;  %s109_s8 = sadd.s32 1, %s1310_s26 }
   0x9   : > { %s106_s9 = ssub.s32 %s1314_s27, %s1387_s30  ;;  %p119_p0 = scmp.ne.s32.totalorder %s1310_s26, %s1306_s25 }
   0xa   : > { %p107_p1 = scmp.eq.s32.totalorder %s106_s9, 0  ;;  %p120_p2 = scmp.eq.s32.totalorder %s1383_s28, 1 }
   0xb   : > { %p125_p3 = scmp.ne.s32.totalorder %s1306_s25, %s1302_s24  ;;  %p126_p4 = scmp.eq.s32.totalorder %s1075_s29, 1 }
   0xc   : > { %s1398_s10 = scalar_select %p107_p1, %s1310_s26, %s109_s8  }
   0xd   : > { %p1400_p5 = por %p120_p2, %p119_p0  ;;  %p1404_p6 = por %p126_p4, %p125_p3 }
   0xe   : > { %p1078_p7 = scmp.ge.s32.totalorder %s1314_s27, 1  ;;  %p271_p8 = scmp.lt.s32.totalorder %s1314_s27, 3 }
  0x10   : > { %p272_p9 = pnand %p1078_p7, %p271_p8 }
  0x11   : > { %p328_p10 = scmp.lt.s32.totalorder (!%p272_p9), %s1383_s28, 1  ;;  %vm357_vm0 = vcmask (!%p272_p9), 64512   ;;  %s1606_s0 = sld [smem:[#allocation8_spill]] (!%p272_p9)  ;;  %v1316_v15 = vmov (!%p272_p9), 0.0|0.0   ;;  %vm1318_vm1 = vmmov (!%p272_p9), 0   ;;  %v1319_v19 = vmov (!%p272_p9), 0.0  }
  0x12   : > { %275 = sbr.rel (%p272_p9) target bundleno = 1220 (0x4c4), region = 32  ;;  %1141 = vmatprep.subr.bf16.mxu0 (!%p272_p9), %v1316_v15  ;;  %1144 = vmatprep.subr.bf16.mxu1 (!%p272_p9), %v1316_v15  ;;  %s1317_s21 = smov (!%p272_p9), 120   ;;  %vm422_vm2 = vcmask (!%p272_p9), 130048   ;;  %vm496_vm3 = vcmask (!%p272_p9), 392192   ;;  %v711_v53 = vlaneseq (!%p272_p9)  ;;  %vm754_vm6 = vcmask (!%p272_p9), 0  }
  0x13   : > { %1117 = vmatprep.mubr.msk.f32.mxu0 (!%p272_p9), %vm1318_vm1, %v1319_v19  ;;  %1124 = vmatprep.mubr.msk.f32.mxu1 (!%p272_p9), %vm1318_vm1, %v1319_v19  ;;  %s1450_s8 = sand.u32 (!%p272_p9), 1, %s1306_s25   ;;  %s1601_s22 = sshll.u32 (!%p272_p9), %s1383_s28, 7 }
  0x14   : > { %s1602_s9 = sshll.u32 (!%p272_p9), %s1450_s8, 3  ;;  %v1470_v58 = vshrl.u32 (!%p272_p9), %v711_v53, 7  ;;  %v1472_v59 = vand.u32 (!%p272_p9), 127, %v711_v53  ;;  %s1320_s23 = smov (!%p272_p9), [#allocation2]  }
  0x16   : > { %vm715_vm4 = vcmp.eq.s32.totalorder (!%p272_p9), %v1470_v58, %v1472_v59  ;;  %vm808_vm5 = vcmp.ge.s32.totalorder (!%p272_p9), %v1472_v59, %v1470_v58 }
  0x19   : > { %s1412_s13 = scalar_select %p328_p10, %s1383_s28, 1 }
  0x1b   : > { %s1415_s14 = sshll.u32 %s1412_s13, 4  ;;  %s1085_s15 = sshll.u32 %s1412_s13, 3 }
  0x1c   : > { %s332_s17 = scalar_lea.vmem %s1606_s0, %s1415_s14  ;;  %s337_s20 = scalar_lea.vmem %s1594_s1, %s1415_s14 }
  0x1d   : > { %v353_v0 = vld [vmem:[%s332_s17] sm:$0xff]  ;;  %v354_v1 = vld [vmem:[%s332_s17 + $0x8] sm:$0xff]  ;;  %s346_s29 = scalar_lea.vmem %s1598_s5, %s1415_s14  ;;  %s1455_s14 = scalar_lea.vmem [#allocation2], %s1602_s9 }
  0x1e   : > { %v358_v2 = vsel %vm357_vm0, %v353_v0, -inf  ;;  %v361_v3 = vsel %vm357_vm0, %v354_v1, -inf  ;;  %v1201_v14 = vpack.i.bf16 %v354_v1, %v353_v0  ;;  %v355_v16 = vld [vmem:[%s337_s20] sm:$0xff]  ;;  %v1429_v17 = vld [vmem:[%s337_s20 + $0x8] sm:$0xff]  ;;  %s341_s18 = scalar_lea.vmem %s1595_s2, %s1085_s15  ;;  %s1502_s15 = scalar_lea.hbm %s1596_s3, %s1601_s22 }
  0x1f   : > { %359 = vmax.xlane.f32.xlu0 %v358_v2  ;;  %v1145_v18 = vpack.c.bf16 %v1429_v17, %v355_v16  ;;  %v716_v40 = vmul.f32 %v355_v16, %v355_v16  ;;  %v717_v46 = vmul.f32 %v1429_v17, %v1429_v17  ;;  %s875_s16 = sshll.u32 %s1455_s14, 4  ;;  %s349_s19 = scalar_lea.vmem %s1599_s6, %s1412_s13  ;;  %s1509_s16 = int_to_ptr.vmem [resolvable:$true] %s875_s16 }
  0x20   : > { %s846_s20 = scalar_lea.sflag [#allocation3], %s1450_s8 }
  0x21   : > { %1146 = vmatpush3.bf16.msra.mxu1 %v1145_v18  ;;  %v718_v45 = vsel %vm422_vm2, %v716_v40, 0.0  ;;  %v721_v48 = vsel %vm422_vm2, %v717_v46, 0.0  ;;  %v803_v40 = vld [vmem:[%s341_s18] sm:$0xff] }
  0x22   : > { %1150 = vmatprep.subr.bf16.mxu1 %v1316_v15 }
  0x23   : > { %362 = vmax.xlane.f32.xlu0 %v361_v3 }
  0xac   : > { %v360_v4 = vpop.xlane.xlu0 %359 }
  0xad   : > { %v364_v5 = vsub.f32 %v353_v0, %v360_v4 }
  0xaf   : > { %v366_v6 = vmul.f32 1.442695, %v364_v5 }
  0xb0   : > { %v363_v7 = vpop.xlane.xlu0 %362 }
  0xb1   : > { %1206 = vpow2.f32 %v366_v6  ;;  %v365_v8 = vsub.f32 %v354_v1, %v363_v7 }
  0xb3   : > { %v368_v9 = vmul.f32 1.442695, %v365_v8 }
  0xb5   : > { %1208 = vpow2.f32 %v368_v9 }
  0xbb   : > { %v1207_v10 = vpop.eup %1206 }
  0xbc   : > { %v370_v11 = vsel %vm357_vm0, %v1207_v10, 0.0 }
  0xbd   : > { %371 = vadd.xlane.f32.xlu1 %v370_v11 }
  0xbf   : > { %v1209_v12 = vpop.eup %1208 }
  0xc0   : > { %v373_v13 = vsel %vm357_vm0, %v1209_v12, 0.0 }
  0xc1   : > { %374 = vadd.xlane.f32.xlu1 %v373_v13 }
  0xd2   : > { %1202 = vrot.lane.b32.xlu1 %v1201_v14, %s1317_s21  ;;  %s352_s21 = scalar_lea.vmem %s1600_s7, %s1412_s13 }
 0x14a   : > { %v372_v20 = vpop.xlane.xlu1 %371 }
 0x14b   : > { %1210 = vrcp.f32 %v372_v20 }
 0x14e   : > { %v375_v21 = vpop.xlane.xlu1 %374 }
 0x14f   : > { %1212 = vrcp.f32 %v375_v21 }
 0x152   : > { %v1203_v22 = vpop.permute.xlu1 %1202 }
 0x153   : > { %v1205_v23 = vunpack.i.h.bf16 %v1203_v22  ;;  %v1204_v24 = vunpack.i.l.bf16 %v1203_v22 }
 0x155   : > { %v1211_v25 = vpop.eup %1210  ;;  %v1142_v26 = vpack.c.bf16 %v1205_v23, %v1204_v24 }
 0x156   : > { %v377_v27 = vmul.f32 %v1211_v25, %v1207_v10 }
 0x157   : > { %1143 = vmatpush3.bf16.msra.mxu0 %v1142_v26 }
 0x158   : > { %380 = vst.msk [vmem:[%s346_s29] sm:$0xff] %vm357_vm0, %v377_v27  ;;  %382 = vxpose.xlu0.b32.start [1/2] (short) (narrow) %v377_v27, 8  ;;  %1147 = vmatprep.subr.bf16.mxu0 %v1316_v15  ;;  %v758_v38 = vadd.f32 1e-15, %v377_v27  ;;  %v756_v52 = vsub.f32 0.0, %v377_v27 }
 0x159   : > { %v1213_v28 = vpop.eup %1212 }
 0x15a   : > { %v379_v29 = vmul.f32 %v1213_v28, %v1209_v12  ;;  %1214 = vlog2.f32 %v758_v38 }
 0x15c   : > { %381 = vst.msk [vmem:[%s346_s29 + $0x8] sm:$0xff] %vm357_vm0, %v379_v29  ;;  %383 = vxpose.xlu0.b32.end [2/2] (short) (narrow) %v379_v29, 8  ;;  %v1148_v30 = vpack.c.bf16 %v379_v29, %v377_v27  ;;  %v759_v39 = vadd.f32 1e-15, %v379_v29  ;;  %v757_v57 = vsub.f32 0.0, %v379_v29  ;;  %s1224_s29 = sshll.u32 %s1320_s23, 4  ;;  %s1225_s29 = int_to_ptr.vmem [resolvable:$false] %s1224_s29 }
 0x15d   : > { %p1227_p0 = scmp.lt.s32.totalorder %s1509_s16, %s1225_s29 }
 0x15e   : > { %1216 = vlog2.f32 %v759_v39 }
 0x164   : > { %v1215_v47 = vpop.eup %1214 }
 0x165   : > { %v761_v50 = vmul.f32 0.6931472, %v1215_v47 }
 0x167   : > { %v764_v55 = vmul.f32 %v761_v50, %v756_v52 }
 0x168   : > { %v1217_v51 = vpop.eup %1216 }
 0x169   : > { %v763_v56 = vmul.f32 0.6931472, %v1217_v51  ;;  %v766_v60 = vsel %vm357_vm0, %v764_v55, 0.0 }
 0x16b   : > { %v765_v61 = vmul.f32 %v763_v56, %v757_v57 }
 0x16d   : > { %v769_v62 = vsel %vm357_vm0, %v765_v61, 0.0 }
 0x1d8   : > { %v398_v31 = vpop.trf.xlu0 }
 0x1d9   : > { %1118 = vmatmul.mubr.msk.f32.vlgmr.msra.gmra.mrb[0].mxu0 %vm422_vm2, %v398_v31  ;;  %1125 = vmatmul.mubr.msk.f32.vlgmr.msra.gmra.mrb[0].mxu1 %vm422_vm2, %v398_v31 }
 0x1da   : > { %1149 = vmatpush3.bf16.msra.mxu0 %v1148_v30  ;;  %1152 = vmatpush3.bf16.msra.mxu1 %v1148_v30 }
 0x1db   : > { %1138 = vmatprep.mubr.msk.f32.mxu1 %vm1318_vm1, %v1319_v19  ;;  %1131 = vmatprep.mubr.msk.f32.mxu0 %vm1318_vm1, %v1319_v19 }
 0x1dd   : > { %1139 = vmatmul.mubr.msk.f32.vlgmr.msra.gmra.mrb[2].mxu1 %vm422_vm2, %v398_v31 }
 0x2ac   : > { %v492_v32 = vpop.f32.mrb[0].mxu0  ;;  %v564_v33 = vpop.f32.mrb[0].mxu1 }
 0x2ad   : > { %497 = vst.msk [vmem:[%s1455_s14] sm:$0xff] %vm496_vm3, %v492_v32  ;;  %v1119_v34 = vpop.f32.mrb[1].mxu0  ;;  %v1126_v35 = vpop.f32.mrb[1].mxu1  ;;  %1132 = vmatmul.mubr.msk.f32.vlgmr.msra.gmra.mrb[2].mxu0 %vm422_vm2, %v564_v33  ;;  %s1226_s14 = scalar_lea.vmem %s1225_s29, 256 }
 0x2b0   : > { %v707_v36 = vpop.f32.mrb[2].mxu1 }
 0x2b1   : > { %v1140_v37 = vpop.f32.mrb[3].mxu1  ;;  %v741_v49 = vmul.f32 %v707_v36, %v707_v36 }
 0x2b3   : > { %v742_v54 = vsel %vm357_vm0, %v741_v49, 0.0 }
 0x380   : > { %v1459_v41 = vpop.f32.mrb[2].mxu0 }
 0x381   : > { %v1133_v42 = vpop.f32.mrb[3].mxu0  ;;  %v789_v43 = vsel %vm357_vm0, %v1459_v41, -inf  ;;  %v780_v44 = vsel %vm357_vm0, %v1459_v41, inf  ;;  %v731_v63 = vsel %vm715_vm4, %v1459_v41, 0.0 }
 0x382   : > { %790 = vmax.xlane.f32.xlu0 %v789_v43  ;;  %781 = vmin.xlane.f32.xlu1 %v780_v44  ;;  %v732_v0 = vsel %vm357_vm0, %v731_v63, 0.0 }
 0x386   : > { %719 = vadd.xlane.f32.xlu1 %v718_v45 }
 0x38a   : > { %722 = vadd.xlane.f32.xlu1 %v721_v48 }
 0x38e   : > { %743 = vadd.xlane.f32.xlu1 %v742_v54 }
 0x392   : > { %767 = vadd.xlane.f32.xlu1 %v766_v60 }
 0x396   : > { %770 = vadd.xlane.f32.xlu1 %v769_v62 }
 0x39a   : > { %733 = vadd.xlane.f32.xlu1 %v732_v0 }
 0x40f   : > { %v791_v1 = vpop.xlane.xlu0 %790  ;;  %v782_v2 = vpop.xlane.xlu1 %781 }
 0x410   : > { %v792_v3 = vrot.slane %v791_v1, 4  ;;  %v783_v4 = vrot.slane %v782_v2, 4 }
 0x412   : > { %v793_v5 = vmax.f32 %v791_v1, %v792_v3  ;;  %v784_v6 = vmin.f32 %v782_v2, %v783_v4 }
 0x413   : > { %v720_v7 = vpop.xlane.xlu1 %719 }
 0x414   : > { %v794_v8 = vrot.slane %v793_v5, 2  ;;  %v785_v9 = vrot.slane %v784_v6, 2 }
 0x416   : > { %v795_v10 = vmax.f32 %v793_v5, %v794_v8  ;;  %v786_v11 = vmin.f32 %v784_v6, %v785_v9 }
 0x417   : > { %v723_v12 = vpop.xlane.xlu1 %722 }
 0x418   : > { %v796_v13 = vrot.slane %v795_v10, 1  ;;  %v787_v14 = vrot.slane %v786_v11, 1  ;;  %v724_v17 = vadd.f32 %v723_v12, %v720_v7 }
 0x41a   : > { %v797_v15 = vmax.f32 %v795_v10, %v796_v13  ;;  %v788_v16 = vmin.f32 %v786_v11, %v787_v14  ;;  %v725_v22 = vrot.slane %v724_v17, 4 }
 0x41b   : > { %v744_v18 = vpop.xlane.xlu1 %743 }
 0x41c   : > { %v799_v20 = vsub.f32 %v797_v15, %v788_v16  ;;  %v726_v24 = vadd.f32 %v725_v22, %v724_v17  ;;  %v745_v25 = vrot.slane %v744_v18, 4  ;;  %v798_v34 = vsub.f32 %v1459_v41, %v788_v16 }
 0x41e   : > { %v800_v21 = vmax.f32 %v799_v20, 1e-12  ;;  %v727_v28 = vrot.slane %v726_v24, 2  ;;  %v746_v29 = vadd.f32 %v745_v25, %v744_v18 }
 0x41f   : > { %v768_v23 = vpop.xlane.xlu1 %767 }
 0x420   : > { %1218 = vrcp.f32 %v800_v21  ;;  %v728_v36 = vadd.f32 %v727_v28, %v726_v24  ;;  %v747_v37 = vrot.slane %v746_v29, 2 }
 0x422   : > { %v729_v47 = vrot.slane %v728_v36, 1  ;;  %v748_v48 = vadd.f32 %v747_v37, %v746_v29 }
 0x423   : > { %v771_v26 = vpop.xlane.xlu1 %770 }
 0x424   : > { %v772_v27 = vadd.f32 %v771_v26, %v768_v23  ;;  %v730_v54 = vadd.f32 %v729_v47, %v728_v36  ;;  %v749_v55 = vrot.slane %v748_v48, 1 }
 0x426   : > { %v773_v30 = vrot.slane %v772_v27, 4  ;;  %v750_v60 = vadd.f32 %v749_v55, %v748_v48 }
 0x427   : > { %v734_v31 = vpop.xlane.xlu1 %733 }
 0x428   : > { %v774_v32 = vadd.f32 %v773_v30, %v772_v27  ;;  %v735_v33 = vrot.slane %v734_v31, 4 }
 0x42a   : > { %v1219_v35 = vpop.eup %1218  ;;  %v775_v38 = vrot.slane %v774_v32, 2  ;;  %v736_v39 = vadd.f32 %v735_v33, %v734_v31 }
 0x42b   : > { %v802_v42 = vmul.f32 %v1219_v35, %v798_v34 }
 0x42c   : > { %v776_v43 = vadd.f32 %v775_v38, %v774_v32  ;;  %v737_v44 = vrot.slane %v736_v39, 2 }
 0x42d   : > { %v804_v45 = vadd.f32 %v803_v40, %v802_v42  ;;  %v805_v46 = vsub.f32 1.0, %v802_v42 }
 0x42e   : > { %v777_v49 = vrot.slane %v776_v43, 1  ;;  %v738_v41 = vadd.f32 %v737_v44, %v736_v39 }
 0x42f   : > { %vm806_vm7 = vcmp.ge.f32.partialorder %v804_v45, %v805_v46 }
 0x430   : > { %v778_v50 = vadd.f32 %v777_v49, %v776_v43  ;;  %v739_v51 = vrot.slane %v738_v41, 1  ;;  %v807_v52 = vsel %vm806_vm7, 1.0, %v1319_v19 }
 0x431   : > { %v809_v53 = vsel %vm808_vm5, %v807_v52, 0.0 }
 0x432   : > { %779 = vst.msk [vmem:[%s352_s21] sm:$0x1] %vm754_vm6, %v778_v50  ;;  %v740_v56 = vadd.f32 %v739_v51, %v738_v41  ;;  %810 = vxpose.xlu1.b32.start.end [1/1] (short) (narrow) %v809_v53, 8  ;;  %s1220_s21 = scalar_lea.vmem %s1509_s16, 128 }
 0x433   : > { %p1221_p11 = scmp.ne.s32.totalorder %s1509_s16, %s1220_s21  ;;  %p1228_p1 = scmp.lt.s32.totalorder %s1226_s14, %s1220_s21 }
 0x434   : > { %v751_v57 = vmul.f32 2.0, %v740_v56 }
 0x435   : > { %p1222_p12 = pnand %p1221_p11, %p1400_p5  ;;  %p1229_p2 = por %p1228_p1, %p1227_p0 }
 0x436   : > { %v752_v61 = vsub.f32 %v730_v54, %v751_v57 }
 0x437   : > { %p1223_p13 = pneg %p1222_p12 }
 0x438   : > { %v753_v19 = vadd.f32 %v752_v61, %v750_v60 }
 0x439   : > { %p1230_p3 = pnand %p1229_p2, %p1223_p13 }
 0x43b   : > { %1233 = shalt.err (!%p1230_p3)
}
 0x43c   : > { %s1234_s17 = scalar_lea.hbm %s1502_s15, 128  ;;  %s1238_s23 = scalar_lea.hbm %s1596_s3, 256 }
 0x43d   : > { %p1235_p4 = scmp.ne.s32.totalorder %s1502_s15, %s1234_s17  ;;  %p1239_p9 = scmp.lt.u32.totalorder %s1502_s15, %s1596_s3 }
 0x43e   : > { %p1240_p10 = scmp.lt.u32.totalorder %s1238_s23, %s1234_s17  ;;  %p1242_p12 = scmp.lt.u32.totalorder %s1234_s17, %s1502_s15 }
 0x43f   : > { %p1236_p7 = pnand %p1235_p4, %p1400_p5 }
 0x440   : > { %p1241_p11 = por %p1240_p10, %p1239_p9 }
 0x441   : > { %p1237_p8 = pneg %p1236_p7 }
 0x442   : > { %p1243_p13 = por %p1242_p12, %p1241_p11 }
 0x444   : > { %p1244_p0 = pnand %p1243_p13, %p1237_p8 }
 0x446   : > { %1247 = shalt.err (!%p1244_p0)
}
 0x447   : > { %1153 = dma.vmem_to_hbm [thread:$0]  (%p1400_p5), %s1509_s16, 128, %s1502_s15, %s846_s20   ;;  %755 = vst.msk [vmem:[%s349_s19] sm:$0x1] %vm754_vm6, %v753_v19 }
 0x448   : > { %s1607_s21 = sshll.u32 %s1450_s8, 3  ;;  %s1608_s18 = sshll.u32 %s1383_s28, 7 }
 0x449   : > { %s310_s14 = scalar_lea.vmem [#allocation4], %s1607_s21  ;;  %s1546_s0 = scalar_lea.hbm %s1597_s4, %s1608_s18 }
 0x44a   : > { %s888_s17 = sshll.u32 %s310_s14, 4  ;;  %s851_s13 = scalar_lea.sflag [#allocation5], %s1450_s8  ;;  %s1548_s17 = int_to_ptr.vmem [resolvable:$true] %s888_s17 }
 0x44b   : > { %s1248_s15 = scalar_lea.vmem %s1548_s17, 128  ;;  %s1321_s28 = smov [#allocation4]  }
 0x44c   : > { %p1249_p1 = scmp.ne.s32.totalorder %s1548_s17, %s1248_s15  ;;  %s1252_s16 = sshll.u32 %s1321_s28, 4  ;;  %s1253_s16 = int_to_ptr.vmem [resolvable:$false] %s1252_s16 }
 0x44d   : > { %s1254_s19 = scalar_lea.vmem %s1253_s16, 256  ;;  %p1255_p4 = scmp.lt.s32.totalorder %s1548_s17, %s1253_s16 }
 0x44e   : > { %p1250_p2 = pnand %p1249_p1, %p1400_p5  ;;  %p1256_p7 = scmp.lt.s32.totalorder %s1254_s19, %s1248_s15 }
 0x450   : > { %p1251_p3 = pneg %p1250_p2  ;;  %p1257_p8 = por %p1256_p7, %p1255_p4 }
 0x452   : > { %p1258_p9 = pnand %p1257_p8, %p1251_p3 }
 0x4b2   : > { %v826_v62 = vpop.trf.xlu1 }
 0x4b3   : > { %v842_v63 = vadd.f32 %v826_v62, %v809_v53 }
 0x4b5   : > { %v843_v0 = vsel %vm715_vm4, 1.0, %v842_v63 }
 0x4b6   : > { %844 = vst.msk [vmem:[%s310_s14] sm:$0xff] %vm357_vm0, %v843_v0 }
 0x4b7   : > { %1261 = shalt.err (!%p1258_p9)
}
 0x4b8   : > { %s1262_s8 = scalar_lea.hbm %s1546_s0, 128  ;;  %s1266_s9 = scalar_lea.hbm %s1597_s4, 256 }
 0x4b9   : > { %p1263_p10 = scmp.ne.s32.totalorder %s1546_s0, %s1262_s8  ;;  %p1267_p13 = scmp.lt.u32.totalorder %s1546_s0, %s1597_s4 }
 0x4ba   : > { %p1268_p0 = scmp.lt.u32.totalorder %s1266_s9, %s1262_s8  ;;  %p1270_p2 = scmp.lt.u32.totalorder %s1262_s8, %s1546_s0 }
 0x4bb   : > { %p1264_p11 = pnand %p1263_p10, %p1400_p5 }
 0x4bc   : > { %p1269_p1 = por %p1268_p0, %p1267_p13 }
 0x4bd   : > { %p1265_p12 = pneg %p1264_p11 }
 0x4be   : > { %p1271_p3 = por %p1270_p2, %p1269_p1 }
 0x4c0   : > { %p1272_p4 = pnand %p1271_p3, %p1265_p12 }
 0x4c2   : > { %1275 = shalt.err (!%p1272_p4)
}
 0x4c3   : > { %1154 = dma.vmem_to_hbm [thread:$0]  (%p1400_p5), %s1548_s17, 128, %s1546_s0, %s851_s13  }
 0x4c4 PF: > { %p1164_p7 = scmp.ge.s32.totalorder %s1314_s27, 2  ;;  %s909_s18 = sand.u32 1, %s1302_s24  }
 0x4c5   : > { %s910_s23 = scalar_lea.sflag [#allocation3], %s909_s18 }
 0x4c6   : > { %p1158_p8 = pnand %p1164_p7, %p1404_p6 }
 0x4c8   : > { %1293 = dma.done.wait (!%p1158_p8), %s910_s23, 128  }
 0x4c9   : > { %1295 = vsyncadd (!%p1158_p8), %s910_s23, 4294967168  ;;  %s919_s29 = scalar_lea.sflag [#allocation5], %s909_s18 }
 0x4ca   : > { %1297 = dma.done.wait (!%p1158_p8), %s919_s29, 128  }
 0x4cb   : > { %1299 = vsyncadd (!%p1158_p8), %s919_s29, 4294967168  ;;  %p21_p5 = scmp.ge.s32.totalorder %s1387_s30, 4   ;;  %s1609_s24 = smov %s1306_s25 }
 0x4cc   : > { %s1610_s25 = smov %s1310_s26  ;;  %s1611_s26 = smov %s1398_s10 }
 0x4cd   : > { %s1612_s27 = smov %s1387_s30  ;;  %23 = sbr.rel (!%p21_p5) target bundleno = 7 (0x7), region = 126 }
 0x4d4   :  { %944 = vsyncpa [#allocation3], 1 }
 0x4d5   :  { %946 = vsyncpa [#allocation3 + $0x1], 1 }
 0x4d6   :  { %947 = vsyncpa [#allocation5], 1 }
 0x4d7   :  { %949 = vsyncpa [#allocation5 + $0x1], 1 }

// kernel: diffpool_layer_forward.2
= control target key start
LH: loop header
LB: loop body
LE: loop exit
PB: predicated region body
PF: predicated region fallthrough
CT: control target
= control target key end

     0   :  { %vm51_vm0 = vcmask 130048   ;;  %s2340_s28 = smov 8   ;;  %vm264_vm1 = vcmask 64512   ;;  %v271_v48 = vlaneseq  ;;  %vm851_vm2 = vcmask 261120   ;;  %s2343_s23 = smov 32   ;;  %s3029_s0 = inlined_call_operand.vmem [shape: f32[32,8], index: 0, kind: input, shape index: {}]   ;;  %s3030_s1 = inlined_call_operand.vmem [shape: f32[2,16,16], index: 1, kind: input, shape index: {}]   ;;  %s3031_s9 = inlined_call_operand.vmem [shape: f32[16,16], index: 9, kind: input, shape index: {}]   ;;  %s3032_s2 = inlined_call_operand.vmem [shape: f32[16,16], index: 2, kind: input, shape index: {}]   ;;  %s3033_s6 = inlined_call_operand.vmem [shape: f32[6,16], index: 6, kind: input, shape index: {}]   ;;  %s3034_s12 = inlined_call_operand.vmem [shape: f32[6,16], index: 12, kind: input, shape index: {}]   ;;  %s3035_s10 = inlined_call_operand.vmem [shape: f32[32,16], index: 10, kind: input, shape index: {}]   ;;  %s3036_s3 = inlined_call_operand.vmem [shape: f32[32,16], index: 3, kind: input, shape index: {}]   ;;  %s3037_s4 = inlined_call_operand.vmem [shape: f32[32,8], index: 4, kind: input, shape index: {}]   ;;  %s3038_s11 = inlined_call_operand.vmem [shape: f32[32,16], index: 11, kind: input, shape index: {}]   ;;  %s3039_s7 = inlined_call_operand.vmem [shape: f32[1,8], index: 7, kind: input, shape index: {}]   ;;  %s3040_s5 = inlined_call_operand.vmem [shape: f32[40,8], index: 5, kind: input, shape index: {}]   ;;  %s3041_s13 = inlined_call_operand.vmem [shape: f32[1,16], index: 13, kind: input, shape index: {}]   ;;  %s3042_s8 = inlined_call_operand.vmem [shape: f32[1,8], index: 8, kind: input, shape index: {}]   ;;  %s3043_s14 = inlined_call_operand.vmem [shape: f32[32,56], index: 14, kind: output, shape index: {}]  }
   0x1   :  { %v76_v0 = vld [vmem:[%s3029_s0] sm:$0xff]  ;;  %v77_v1 = vld [vmem:[%s3029_s0 + $0x8] sm:$0xff]  ;;  %v78_v2 = vld [vmem:[%s3029_s0 + $0x10] sm:$0xff]  ;;  %vm1782_vm3 = vcmask 326656   ;;  %vm1924_vm4 = vcmask 195584   ;;  %vm1933_vm5 = vcmask 457728  }
   0x2   :  { %v2196_v3 = vpack.c.bf16 %v77_v1, %v76_v0  ;;  %v79_v4 = vld [vmem:[%s3029_s0 + $0x18] sm:$0xff]  ;;  %v2436_v5 = vld [vmem:[%s3030_s1] sm:$0xff]  ;;  %v2443_v7 = vld [vmem:[%s3030_s1 + $0x10] sm:$0xff]  ;;  %v2511_v49 = vshrl.u32 %v271_v48, 7 }
   0x3   :  { %v2200_v6 = vpack.c.bf16 %v79_v4, %v78_v2  ;;  %2066 = vmatprep.mubr.msk.f32.mxu0 %vm51_vm0, %v2436_v5  ;;  %v52_v8 = vsel %vm51_vm0, %v2436_v5, 0.0  ;;  %2073 = vmatprep.mubr.msk.f32.mxu1 %vm51_vm0, %v2443_v7  ;;  %v58_v9 = vsel %vm51_vm0, %v2443_v7, 0.0  ;;  %v2454_v10 = vld [vmem:[%s3030_s1 + $0x8] sm:$0xff]  ;;  %v2459_v11 = vld [vmem:[%s3030_s1 + $0x18] sm:$0xff]  ;;  %v465_v14 = vld [vmem:[%s3031_s9] sm:$0xff] }
   0x4   :  { %2197 = vmatprep.subr.bf16.mxu0 %v2196_v3  ;;  %53 = vadd.xlane.f32.xlu0 %v52_v8  ;;  %v55_v12 = vsel %vm51_vm0, %v2454_v10, 0.0  ;;  %v61_v13 = vsel %vm51_vm0, %v2459_v11, 0.0  ;;  %v466_v15 = vld [vmem:[%s3031_s9 + $0x8] sm:$0xff]  ;;  %v269_v16 = vld [vmem:[%s3032_s2] sm:$0xff]  ;;  %v273_v50 = vsub.s32 0, %v2511_v49 }
   0x5   :  { %2199 = vmatpush3.bf16.msra.mxu0 %v2196_v3  ;;  %2201 = vmatprep.subr.bf16.mxu1 %v2200_v6  ;;  %v2208_v17 = vpack.c.bf16 %v466_v15, %v465_v14  ;;  %v270_v18 = vld [vmem:[%s3032_s2 + $0x8] sm:$0xff]  ;;  %v2517_v51 = vld [vmem:[%s3033_s6] sm:$0x3f]  ;;  %s2341_s6 = smov 16   ;;  %s2342_s2 = smov 112  }
   0x6   :  { %2203 = vmatpush3.bf16.msra.mxu1 %v2200_v6  ;;  %59 = vadd.xlane.f32.xlu1 %v58_v9  ;;  %v2204_v19 = vpack.c.bf16 %v270_v18, %v269_v16  ;;  %v2522_v52 = vld [vmem:[%s3034_s12] sm:$0x3f]  ;;  %v274_v53 = vrot.slane %v2517_v51, %v273_v50 }
   0x7   :  { %2209 = vmatprep.subr.bf16.mxu1 %v2208_v17  ;;  %v470_v54 = vrot.slane %v2522_v52, %v273_v50 }
   0x8   :  { %2067 = vmatmul.mubr.msk.f32.vlgmr.msra.gmra.mrb[0].mxu0 %vm51_vm0, %v2454_v10  ;;  %56 = vadd.xlane.f32.xlu0 %v55_v12 }
   0x9   :  { %2074 = vmatmul.mubr.msk.f32.vlgmr.msra.gmra.mrb[0].mxu1 %vm51_vm0, %v2459_v11  ;;  %2205 = vmatprep.subr.bf16.mxu0 %v2204_v19 }
   0xa   :  { %62 = vadd.xlane.f32.xlu1 %v61_v13  ;;  %2211 = vmatpush3.bf16.msra.mxu1 %v2208_v17 }
   0xb   :  { %2207 = vmatpush3.bf16.msra.mxu0 %v2204_v19 }
  0x1b   :  { %254 = vrot.lane.b32.xlu1 %v77_v1, %s2340_s28 }
  0x1e   :  { %252 = vrot.lane.b32.xlu0 %v76_v0, %s2340_s28 }
  0x1f   :  { %256 = vrot.lane.b32.xlu1 %v78_v2, %s2340_s28 }
  0x23   :  { %258 = vrot.lane.b32.xlu1 %v79_v4, %s2340_s28 }
  0x91   :  { %v54_v20 = vpop.xlane.xlu0 %53 }
  0x92   :  { %v64_v26 = vmax.f32 %v54_v20, 1.0 }
  0x93   :  { %v60_v21 = vpop.xlane.xlu1 %59 }
  0x94   :  { %v66_v25 = vmax.f32 %v60_v21, 1.0 }
  0x95   :  { %v57_v22 = vpop.xlane.xlu0 %56 }
  0x96   :  { %v65_v23 = vmax.f32 %v57_v22, 1.0 }
  0x97   :  { %v63_v24 = vpop.xlane.xlu1 %62 }
  0x98   :  { %2274 = vrcp.f32 %v65_v23  ;;  %v67_v27 = vmax.f32 %v63_v24, 1.0 }
  0x99   :  { %2276 = vrcp.f32 %v66_v25  ;;  %v253_v30 = vpop.permute.xlu0 %252 }
  0x9a   :  { %2278 = vrcp.f32 %v64_v26 }
  0x9b   :  { %2280 = vrcp.f32 %v67_v27  ;;  %v255_v28 = vpop.permute.xlu1 %254 }
  0x9f   :  { %v257_v33 = vpop.permute.xlu1 %256 }
  0xa2   :  { %v2485_v29 = vpop.eup %2274 }
  0xa3   :  { %v2487_v31 = vpop.eup %2276  ;;  %v259_v46 = vpop.permute.xlu1 %258 }
  0xa4   :  { %v2489_v34 = vpop.eup %2278 }
  0xa5   :  { %v2492_v38 = vpop.eup %2280 }
  0xdb   :  { %v2068_v32 = vpop.f32.mrb[0].mxu0 }
  0xdc   :  { %v243_v35 = vmul.f32 %v2485_v29, %v2068_v32  ;;  %v152_v36 = vpop.f32.mrb[1].mxu0  ;;  %v2075_v37 = vpop.f32.mrb[0].mxu1 }
  0xdd   :  { %v242_v39 = vmul.f32 %v2489_v34, %v152_v36  ;;  %v233_v40 = vpop.f32.mrb[1].mxu1  ;;  %v245_v44 = vmul.f32 %v2492_v38, %v2075_v37 }
  0xde   :  { %v244_v41 = vmul.f32 %v2487_v31, %v233_v40  ;;  %v266_v43 = vsel %vm264_vm1, %v243_v35, %v255_v28 }
  0xdf   :  { %v265_v42 = vsel %vm264_vm1, %v242_v39, %v253_v30  ;;  %v268_v47 = vsel %vm264_vm1, %v245_v44, %v259_v46 }
  0xe0   :  { %v267_v45 = vsel %vm264_vm1, %v244_v41, %v257_v33  ;;  %2080 = vmatprep.mubr.msk.f32.mxu0 %vm51_vm0, %v265_v42  ;;  %2090 = vmatprep.mubr.msk.f32.mxu1 %vm51_vm0, %v265_v42 }
  0xe1   :  { %2081 = vmatmul.mubr.msk.f32.vlgmr.msra.gmra.mrb[2].mxu0 %vm51_vm0, %v266_v43  ;;  %2091 = vmatmul.mubr.msk.f32.vlgmr.msra.gmra.mrb[2].mxu1 %vm51_vm0, %v266_v43 }
  0xe2   :  { %2083 = vmatprep.mubr.msk.f32.mxu0 %vm51_vm0, %v267_v45  ;;  %2093 = vmatprep.mubr.msk.f32.mxu1 %vm51_vm0, %v267_v45 }
  0xe5   :  { %2084 = vmatmul.mubr.msk.f32.gmra.mrb[4].mxu0 %vm51_vm0, %v268_v47  ;;  %2094 = vmatmul.mubr.msk.f32.gmra.mrb[4].mxu1 %vm51_vm0, %v268_v47 }
  0xe6   :  { %2100 = vmatprep.mubr.msk.f32.mxu1 %vm51_vm0, %v2436_v5 }
 0x1b4   :  { %v2082_v55 = vpop.f32.mrb[2].mxu0  ;;  %v2092_v56 = vpop.f32.mrb[2].mxu1 }
 0x1b5   :  { %v2526_v57 = vadd.f32 %v2082_v55, %v274_v53  ;;  %v543_v58 = vadd.f32 %v2092_v56, %v470_v54  ;;  %v353_v59 = vpop.f32.mrb[3].mxu0  ;;  %v537_v60 = vpop.f32.mrb[3].mxu1 }
 0x1b6   :  { %v538_v61 = vadd.f32 %v537_v60, %v470_v54  ;;  %v2539_v17 = vadd.f32 %v353_v59, %v274_v53 }
 0x1b7   :  { %v557_v62 = vmul.f32 %v543_v58, %v543_v58  ;;  %v373_v8 = vmul.f32 %v2526_v57, %v2526_v57 }
 0x1b8   :  { %v2085_v63 = vpop.f32.mrb[4].mxu0  ;;  %v2095_v0 = vpop.f32.mrb[4].mxu1  ;;  %v556_v1 = vmul.f32 %v538_v61, %v538_v61  ;;  %v372_v23 = vmul.f32 %v2539_v17, %v2539_v17 }
 0x1b9   :  { %v2528_v2 = vadd.f32 %v2085_v63, %v274_v53  ;;  %v363_v3 = vpop.f32.mrb[5].mxu0  ;;  %v547_v4 = vpop.f32.mrb[5].mxu1  ;;  %v563_v6 = vsel %vm51_vm0, %v557_v62, 0.0  ;;  %v2533_v9 = vadd.f32 %v2095_v0, %v470_v54  ;;  %v379_v15 = vsel %vm51_vm0, %v373_v8, 0.0 }
 0x1ba   :  { %v548_v12 = vadd.f32 %v547_v4, %v470_v54  ;;  %564 = vadd.xlane.f32.xlu1 %v563_v6  ;;  %v560_v13 = vsel %vm51_vm0, %v556_v1, 0.0  ;;  %v2545_v21 = vadd.f32 %v363_v3, %v274_v53  ;;  %v376_v24 = vsel %vm51_vm0, %v372_v23, 0.0 }
 0x1bb   :  { %561 = vadd.xlane.f32.xlu0 %v560_v13  ;;  %v375_v16 = vmul.f32 %v2528_v2, %v2528_v2  ;;  %v559_v19 = vmul.f32 %v2533_v9, %v2533_v9 }
 0x1bc   :  { %v558_v14 = vmul.f32 %v548_v12, %v548_v12  ;;  %v374_v25 = vmul.f32 %v2545_v21, %v2545_v21 }
 0x1bd   :  { %v385_v20 = vsel %vm51_vm0, %v375_v16, 0.0  ;;  %v569_v22 = vsel %vm51_vm0, %v559_v19, 0.0 }
 0x1be   :  { %380 = vadd.xlane.f32.xlu1 %v379_v15  ;;  %v566_v18 = vsel %vm51_vm0, %v558_v14, 0.0  ;;  %v382_v26 = vsel %vm51_vm0, %v374_v25, 0.0 }
 0x1bf   :  { %567 = vadd.xlane.f32.xlu0 %v566_v18 }
 0x1c2   :  { %386 = vadd.xlane.f32.xlu1 %v385_v20 }
 0x1c3   :  { %570 = vadd.xlane.f32.xlu0 %v569_v22 }
 0x1c7   :  { %377 = vadd.xlane.f32.xlu0 %v376_v24 }
 0x1cb   :  { %383 = vadd.xlane.f32.xlu0 %v382_v26 }
 0x247   :  { %v565_v27 = vpop.xlane.xlu1 %564 }
 0x248   :  { %v573_v28 = vmax.f32 %v565_v27, 1e-24  ;;  %v562_v30 = vpop.xlane.xlu0 %561 }
 0x249   :  { %v572_v32 = vmax.f32 %v562_v30, 1e-24 }
 0x24a   :  { %2282 = vrsqrt.f32 %v573_v28 }
 0x24b   :  { %2284 = vrsqrt.f32 %v572_v32  ;;  %v381_v33 = vpop.xlane.xlu1 %380 }
 0x24c   :  { %v389_v35 = vmax.f32 %v381_v33, 1e-24  ;;  %v568_v36 = vpop.xlane.xlu0 %567 }
 0x24d   :  { %v574_v37 = vmax.f32 %v568_v36, 1e-24 }
 0x24f   :  { %2286 = vrsqrt.f32 %v574_v37  ;;  %v387_v39 = vpop.xlane.xlu1 %386 }
 0x250   :  { %2288 = vrsqrt.f32 %v389_v35  ;;  %v571_v40 = vpop.xlane.xlu0 %570  ;;  %v391_v41 = vmax.f32 %v387_v39, 1e-24 }
 0x251   :  { %v575_v42 = vmax.f32 %v571_v40, 1e-24 }
 0x253   :  { %2290 = vrsqrt.f32 %v575_v42 }
 0x254   :  { %v2283_v43 = vpop.eup %2282  ;;  %v378_v44 = vpop.xlane.xlu0 %377  ;;  %2292 = vrsqrt.f32 %v391_v41 }
 0x255   :  { %v2285_v45 = vpop.eup %2284  ;;  %v581_v46 = vmul.f32 %v2283_v43, %v543_v58  ;;  %v388_v47 = vmax.f32 %v378_v44, 1e-24 }
 0x256   :  { %v580_v48 = vmul.f32 %v2285_v45, %v538_v61 }
 0x257   :  { %v2554_v50 = vmax.f32 %v581_v46, 0.0  ;;  %2294 = vrsqrt.f32 %v388_v47 }
 0x258   :  { %v2556_v53 = vmax.f32 %v580_v48, 0.0  ;;  %v384_v54 = vpop.xlane.xlu0 %383 }
 0x259   :  { %v2287_v55 = vpop.eup %2286  ;;  %v603_v56 = vmul.f32 %v2554_v50, %v2554_v50  ;;  %v390_v59 = vmax.f32 %v384_v54, 1e-24  ;;  %v589_v58 = vsel %vm51_vm0, %v2554_v50, 0.0 }
 0x25a   :  { %v2289_v60 = vpop.eup %2288  ;;  %v602_v62 = vmul.f32 %v2556_v53, %v2556_v53  ;;  %v582_v63 = vmul.f32 %v2287_v55, %v548_v12  ;;  %v588_v61 = vsel %vm51_vm0, %v2556_v53, 0.0 }
 0x25b   :  { %2296 = vrsqrt.f32 %v390_v59  ;;  %v607_v3 = vsel %vm51_vm0, %v603_v56, 0.0  ;;  %v397_v4 = vmul.f32 %v2289_v60, %v2526_v57  ;;  %v590_v15 = vadd.f32 %v589_v58, %v588_v61 }
 0x25c   :  { %v2566_v0 = vmax.f32 %v582_v63, 0.0  ;;  %v606_v6 = vsel %vm51_vm0, %v602_v62, 0.0 }
 0x25d   :  { %v2291_v1 = vpop.eup %2290  ;;  %v608_v20 = vadd.f32 %v607_v3, %v606_v6  ;;  %v2579_v22 = vmax.f32 %v397_v4, 0.0 }
 0x25e   :  { %v591_v8 = vsel %vm51_vm0, %v2566_v0, 0.0  ;;  %v604_v12 = vmul.f32 %v2566_v0, %v2566_v0  ;;  %v583_v13 = vmul.f32 %v2291_v1, %v2533_v9  ;;  %v2293_v14 = vpop.eup %2292 }
 0x25f   :  { %v592_v57 = vadd.f32 %v591_v8, %v590_v15  ;;  %v399_v23 = vmul.f32 %v2293_v14, %v2528_v2  ;;  %v419_v33 = vmul.f32 %v2579_v22, %v2579_v22  ;;  %v405_v42 = vsel %vm51_vm0, %v2579_v22, 0.0 }
 0x260   :  { %v609_v16 = vsel %vm51_vm0, %v604_v12, 0.0  ;;  %v2577_v18 = vmax.f32 %v583_v13, 0.0 }
 0x261   :  { %v2295_v19 = vpop.eup %2294  ;;  %v610_v26 = vadd.f32 %v609_v16, %v608_v20  ;;  %v2592_v36 = vmax.f32 %v399_v23, 0.0  ;;  %v423_v48 = vsel %vm51_vm0, %v419_v33, 0.0 }
 0x262   :  { %v593_v24 = vsel %vm51_vm0, %v2577_v18, 0.0  ;;  %v605_v25 = vmul.f32 %v2577_v18, %v2577_v18  ;;  %v396_v9 = vmul.f32 %v2295_v19, %v2539_v17 }
 0x263   :  { %v594_v27 = vadd.f32 %v593_v24, %v592_v57  ;;  %v421_v54 = vmul.f32 %v2592_v36, %v2592_v36  ;;  %v409_v63 = vsel %vm51_vm0, %v2592_v36, 0.0 }
 0x264   :  { %v611_v28 = vsel %vm51_vm0, %v605_v25, 0.0  ;;  %v2588_v30 = vmax.f32 %v396_v9, 0.0 }
 0x265   :  { %v2297_v32 = vpop.eup %2296  ;;  %v595_v35 = vrot.slane %v594_v27, 4  ;;  %v612_v2 = vadd.f32 %v611_v28, %v610_v26  ;;  %v427_v6 = vsel %vm51_vm0, %v421_v54, 0.0 }
 0x266   :  { %v404_v37 = vsel %vm51_vm0, %v2588_v30, 0.0  ;;  %v418_v17 = vmul.f32 %v2588_v30, %v2588_v30  ;;  %v398_v39 = vmul.f32 %v2297_v32, %v2545_v21 }
 0x267   :  { %v596_v40 = vadd.f32 %v595_v35, %v594_v27  ;;  %v613_v41 = vrot.slane %v612_v2, 4  ;;  %v406_v47 = vadd.f32 %v405_v42, %v404_v37 }
 0x268   :  { %v422_v43 = vsel %vm51_vm0, %v418_v17, 0.0  ;;  %v2602_v44 = vmax.f32 %v398_v39, 0.0 }
 0x269   :  { %v597_v45 = vrot.slane %v596_v40, 2  ;;  %v614_v46 = vadd.f32 %v613_v41, %v612_v2  ;;  %v424_v60 = vadd.f32 %v423_v48, %v422_v43  ;;  %v451_v43 = vsub.s32 1, %v2511_v49 }
 0x26a   :  { %v407_v21 = vsel %vm51_vm0, %v2602_v44, 0.0  ;;  %v420_v55 = vmul.f32 %v2602_v44, %v2602_v44 }
 0x26b   :  { %v598_v56 = vadd.f32 %v597_v45, %v596_v40  ;;  %v615_v59 = vrot.slane %v614_v46, 2  ;;  %v408_v62 = vadd.f32 %v407_v21, %v406_v47  ;;  %v636_v54 = vrot.slane %v2522_v52, %v451_v43 }
 0x26c   :  { %v425_v58 = vsel %vm51_vm0, %v420_v55, 0.0 }
 0x26d   :  { %v599_v61 = vrot.slane %v598_v56, 1  ;;  %v616_v1 = vadd.f32 %v615_v59, %v614_v46  ;;  %v410_v3 = vadd.f32 %v409_v63, %v408_v62  ;;  %v426_v4 = vadd.f32 %v425_v58, %v424_v60 }
 0x26e   :  { %v459_v46 = vsub.s32 2, %v2511_v49 }
 0x26f   :  { %v617_v8 = vrot.slane %v616_v1, 1  ;;  %v411_v12 = vrot.slane %v410_v3, 4  ;;  %v428_v13 = vadd.f32 %v427_v6, %v426_v4  ;;  %v600_v14 = vadd.f32 %v599_v61, %v598_v56 }
 0x270   :  { %v644_v60 = vrot.slane %v2522_v52, %v459_v46 }
 0x271   :  { %v618_v15 = vadd.f32 %v617_v8, %v616_v1  ;;  %v412_v16 = vadd.f32 %v411_v12, %v410_v3  ;;  %v429_v19 = vrot.slane %v428_v13, 4  ;;  %v601_v20 = vmul.f32 0.03125, %v600_v14 }
 0x273   :  { %v619_v57 = vmul.f32 0.03125, %v618_v15  ;;  %v413_v23 = vrot.slane %v412_v16, 2  ;;  %v430_v24 = vadd.f32 %v429_v19, %v428_v13  ;;  %v620_v25 = vmul.f32 %v601_v20, %v601_v20 }
 0x274   :  { %v624_v48 = vsub.f32 %v2554_v50, %v601_v20  ;;  %v623_v21 = vsub.f32 %v2556_v53, %v601_v20  ;;  %v625_v55 = vsub.f32 %v2566_v0, %v601_v20  ;;  %v626_v58 = vsub.f32 %v2577_v18, %v601_v20 }
 0x275   :  { %v414_v9 = vadd.f32 %v413_v23, %v412_v16  ;;  %v431_v26 = vrot.slane %v430_v24, 2  ;;  %v621_v27 = vsub.f32 %v619_v57, %v620_v25  ;;  %v452_v0 = vrot.slane %v2517_v51, %v451_v43  ;;  %v1064_v43 = vld [vmem:[%s3035_s10 + $0x10] sm:$0xff] }
 0x276   :  { %v460_v16 = vrot.slane %v2517_v51, %v459_v46  ;;  %v1065_v46 = vld [vmem:[%s3035_s10 + $0x18] sm:$0xff] }
 0x277   :  { %v415_v28 = vrot.slane %v414_v9, 1  ;;  %v432_v32 = vadd.f32 %v431_v26, %v430_v24  ;;  %v622_v33 = vmax.f32 %v621_v27, 0.0 }
 0x279   :  { %v433_v35 = vrot.slane %v432_v32, 1  ;;  %v627_v2 = vadd.f32 1e-05, %v622_v33  ;;  %v416_v37 = vadd.f32 %v415_v28, %v414_v9 }
 0x27b   :  { %v434_v17 = vadd.f32 %v433_v35, %v432_v32  ;;  %2298 = vrsqrt.f32 %v627_v2  ;;  %v417_v39 = vmul.f32 0.03125, %v416_v37 }
 0x27d   :  { %v435_v40 = vmul.f32 0.03125, %v434_v17  ;;  %v436_v41 = vmul.f32 %v417_v39, %v417_v39  ;;  %v440_v18 = vsub.f32 %v2579_v22, %v417_v39  ;;  %v439_v12 = vsub.f32 %v2588_v30, %v417_v39 }
 0x27e   :  { %v441_v13 = vsub.f32 %v2602_v44, %v417_v39  ;;  %v442_v14 = vsub.f32 %v2592_v36, %v417_v39 }
 0x27f   :  { %v437_v42 = vsub.f32 %v435_v40, %v436_v41 }
 0x281   :  { %v438_v45 = vmax.f32 %v437_v42, 0.0  ;;  %v1062_v42 = vld [vmem:[%s3035_s10] sm:$0xff] }
 0x283   :  { %v443_v47 = vadd.f32 1e-05, %v438_v45 }
 0x285   :  { %v2299_v56 = vpop.eup %2298  ;;  %2300 = vrsqrt.f32 %v443_v47  ;;  %v2232_v47 = vpack.c.bf16 %v1065_v46, %v1064_v43 }
 0x286   :  { %v630_v59 = vmul.f32 %v2299_v56, %v624_v48  ;;  %v629_v62 = vmul.f32 %v2299_v56, %v623_v21  ;;  %v631_v63 = vmul.f32 %v2299_v56, %v625_v55  ;;  %v632_v3 = vmul.f32 %v2299_v56, %v626_v58  ;;  %v844_v48 = vld [vmem:[%s3036_s3 + $0x8] sm:$0xff]  ;;  %v845_v21 = vld [vmem:[%s3036_s3 + $0x10] sm:$0xff]  ;;  %v846_v55 = vld [vmem:[%s3036_s3 + $0x18] sm:$0xff] }
 0x288   :  { %v638_v61 = vmul.f32 %v636_v54, %v630_v59  ;;  %v637_v1 = vmul.f32 %v636_v54, %v629_v62  ;;  %v639_v6 = vmul.f32 %v636_v54, %v631_v63  ;;  %v640_v53 = vmul.f32 %v636_v54, %v632_v3 }
 0x289   :  { %v2224_v59 = vpack.c.bf16 %v846_v55, %v845_v21 }
 0x28a   :  { %v2623_v4 = vadd.f32 %v644_v60, %v638_v61  ;;  %v2625_v50 = vadd.f32 %v644_v60, %v637_v1  ;;  %v2633_v8 = vadd.f32 %v644_v60, %v639_v6  ;;  %v2641_v24 = vadd.f32 %v644_v60, %v640_v53 }
 0x28c   :  { %655 = vrot.lane.b32.xlu1 %v2623_v4, %s2341_s6  ;;  %653 = vrot.lane.b32.xlu0 %v2625_v50, %s2341_s6 }
 0x28f   :  { %v2301_v15 = vpop.eup %2300 }
 0x290   :  { %657 = vrot.lane.b32.xlu1 %v2633_v8, %s2341_s6  ;;  %v446_v19 = vmul.f32 %v2301_v15, %v440_v18  ;;  %v445_v20 = vmul.f32 %v2301_v15, %v439_v12  ;;  %v447_v57 = vmul.f32 %v2301_v15, %v441_v13  ;;  %v448_v23 = vmul.f32 %v2301_v15, %v442_v14 }
 0x292   :  { %v454_v22 = vmul.f32 %v452_v0, %v446_v19  ;;  %v453_v25 = vmul.f32 %v452_v0, %v445_v20  ;;  %v455_v9 = vmul.f32 %v452_v0, %v447_v57  ;;  %v456_v30 = vmul.f32 %v452_v0, %v448_v23 }
 0x294   :  { %659 = vrot.lane.b32.xlu1 %v2641_v24, %s2341_s6  ;;  %v2645_v36 = vadd.f32 %v460_v16, %v454_v22  ;;  %v2647_v44 = vadd.f32 %v460_v16, %v453_v25  ;;  %v2649_v26 = vadd.f32 %v460_v16, %v455_v9  ;;  %v2651_v27 = vadd.f32 %v460_v16, %v456_v30 }
 0x2fe   :  { %v656_v28 = vpop.permute.xlu1 %655  ;;  %v654_v32 = vpop.permute.xlu0 %653 }
 0x2ff   :  { %v666_v33 = vsel %vm51_vm0, %v2645_v36, %v656_v28  ;;  %v665_v35 = vsel %vm51_vm0, %v2647_v44, %v654_v32 }
 0x300   :  { %v2212_v2 = vpack.c.bf16 %v666_v33, %v665_v35 }
 0x302   :  { %v658_v37 = vpop.permute.xlu1 %657  ;;  %2213 = vmatprep.subr.bf16.mxu1 %v2212_v2 }
 0x303   :  { %2215 = vmatpush3.bf16.msra.mxu1 %v2212_v2  ;;  %v667_v39 = vsel %vm51_vm0, %v2649_v26, %v658_v37 }
 0x306   :  { %v660_v17 = vpop.permute.xlu1 %659  ;;  %2101 = vmatmul.mubr.msk.f32.vlgmr.msra.gmra.mrb[6].mxu1 %vm51_vm0, %v2454_v10  ;;  %v1063_v10 = vld [vmem:[%s3035_s10 + $0x8] sm:$0xff] }
 0x307   :  { %v668_v40 = vsel %vm51_vm0, %v2651_v27, %v660_v17  ;;  %2107 = vmatprep.mubr.msk.f32.mxu1 %vm51_vm0, %v2443_v7  ;;  %v2228_v45 = vpack.c.bf16 %v1063_v10, %v1062_v42 }
 0x308   :  { %v2216_v41 = vpack.c.bf16 %v668_v40, %v667_v39 }
 0x30a   :  { %2217 = vmatprep.subr.bf16.mxu1 %v2216_v41 }
 0x30b   :  { %2219 = vmatpush3.bf16.msra.mxu1 %v2216_v41 }
 0x30c   :  { %2229 = vmatprep.subr.bf16.mxu1 %v2228_v45 }
 0x30e   :  { %2108 = vmatmul.mubr.msk.f32.vlgmr.msra.gmra.mrb[8].mxu1 %vm51_vm0, %v2459_v11  ;;  %v843_v11 = vld [vmem:[%s3036_s3] sm:$0xff] }
 0x30f   :  { %2231 = vmatpush3.bf16.msra.mxu1 %v2228_v45  ;;  %v2220_v54 = vpack.c.bf16 %v844_v48, %v843_v11 }
 0x310   :  { %2233 = vmatprep.subr.bf16.mxu1 %v2232_v47 }
 0x311   :  { %2221 = vmatprep.subr.bf16.mxu0 %v2220_v54 }
 0x312   :  { %2223 = vmatpush3.bf16.msra.mxu0 %v2220_v54 }
 0x313   :  { %2235 = vmatpush3.bf16.msra.mxu1 %v2232_v47  ;;  %2225 = vmatprep.subr.bf16.mxu0 %v2224_v59 }
 0x316   :  { %2227 = vmatpush3.bf16.msra.mxu0 %v2224_v59 }
 0x3d9   :  { %v2102_v56 = vpop.f32.mrb[6].mxu1 }
 0x3da   :  { %v820_v60 = vmul.f32 %v2485_v29, %v2102_v56  ;;  %v735_v62 = vpop.f32.mrb[7].mxu1 }
 0x3db   :  { %v819_v63 = vmul.f32 %v2489_v34, %v735_v62 }
 0x3dc   :  { %1048 = vrot.lane.b32.xlu1 %v820_v60, %s2342_s2 }
 0x3dd   :  { %1046 = vrot.lane.b32.xlu0 %v819_v63, %s2342_s2 }
 0x3e1   :  { %v2109_v58 = vpop.f32.mrb[8].mxu1 }
 0x3e2   :  { %v822_v61 = vmul.f32 %v2492_v38, %v2109_v58  ;;  %v810_v1 = vpop.f32.mrb[9].mxu1 }
 0x3e3   :  { %v821_v3 = vmul.f32 %v2487_v31, %v810_v1 }
 0x3e4   :  { %1052 = vrot.lane.b32.xlu1 %v822_v61, %s2342_s2 }
 0x3e5   :  { %1050 = vrot.lane.b32.xlu0 %v821_v3, %s2342_s2 }
 0x3e8   :  { %829 = vrot.lane.b32.xlu1 %v2645_v36, %s2341_s6 }
 0x3e9   :  { %827 = vrot.lane.b32.xlu0 %v2647_v44, %s2341_s6 }
 0x3ec   :  { %833 = vrot.lane.b32.xlu1 %v2651_v27, %s2341_s6 }
 0x3ed   :  { %831 = vrot.lane.b32.xlu0 %v2649_v26, %s2341_s6 }
 0x44e   :  { %v1049_v6 = vpop.permute.xlu1 %1048 }
 0x44f   :  { %v1047_v53 = vpop.permute.xlu0 %1046  ;;  %v1059_v18 = vsel %vm51_vm0, %v1049_v6, %v656_v28 }
 0x450   :  { %v1058_v0 = vsel %vm51_vm0, %v1047_v53, %v654_v32 }
 0x451   :  { %2132 = vmatprep.mubr.msk.f32.mxu1 %vm851_vm2, %v1058_v0 }
 0x452   :  { %2133 = vmatmul.mubr.msk.f32.vlgmr.msra.gmra.mrb[10].mxu1 %vm851_vm2, %v1059_v18 }
 0x456   :  { %v1053_v12 = vpop.permute.xlu1 %1052 }
 0x457   :  { %v1051_v13 = vpop.permute.xlu0 %1050  ;;  %v1061_v15 = vsel %vm51_vm0, %v1053_v12, %v660_v17 }
 0x458   :  { %v1060_v14 = vsel %vm51_vm0, %v1051_v13, %v658_v37 }
 0x459   :  { %2135 = vmatprep.mubr.msk.f32.mxu1 %vm851_vm2, %v1060_v14 }
 0x45a   :  { %v830_v16 = vpop.permute.xlu1 %829  ;;  %2136 = vmatmul.mubr.msk.f32.gmra.mrb[12].mxu1 %vm851_vm2, %v1061_v15 }
 0x45b   :  { %v828_v19 = vpop.permute.xlu0 %827  ;;  %2149 = vmatprep.mubr.msk.f32.mxu1 %vm51_vm0, %v2443_v7  ;;  %v840_v57 = vsel %vm51_vm0, %v820_v60, %v830_v16  ;;  %v849_v7 = vsub.s32 3, %v2511_v49 }
 0x45c   :  { %v839_v20 = vsel %vm51_vm0, %v819_v63, %v828_v19 }
 0x45d   :  { %2118 = vmatprep.mubr.msk.f32.mxu0 %vm851_vm2, %v839_v20  ;;  %v1069_v30 = vrot.slane %v2522_v52, %v849_v7 }
 0x45e   :  { %v834_v23 = vpop.permute.xlu1 %833  ;;  %2119 = vmatmul.mubr.msk.f32.vlgmr.msra.gmra.mrb[6].mxu0 %vm851_vm2, %v840_v57 }
 0x45f   :  { %v832_v22 = vpop.permute.xlu0 %831  ;;  %v842_v9 = vsel %vm51_vm0, %v822_v61, %v834_v23 }
 0x460   :  { %v841_v25 = vsel %vm51_vm0, %v821_v3, %v832_v22 }
 0x461   :  { %2121 = vmatprep.mubr.msk.f32.mxu0 %vm851_vm2, %v841_v25 }
 0x462   :  { %2122 = vmatmul.mubr.msk.f32.gmra.mrb[8].mxu0 %vm851_vm2, %v842_v9 }
 0x463   :  { %2142 = vmatprep.mubr.msk.f32.mxu0 %vm51_vm0, %v2436_v5  ;;  %v850_v5 = vrot.slane %v2517_v51, %v849_v7 }
 0x525   :  { %v2134_v28 = vpop.f32.mrb[10].mxu1 }
 0x526   :  { %v1154_v32 = vadd.f32 %v2134_v28, %v1069_v30  ;;  %v1148_v33 = vpop.f32.mrb[11].mxu1 }
 0x527   :  { %v1149_v35 = vadd.f32 %v1148_v33, %v1069_v30 }
 0x528   :  { %v1168_v2 = vmul.f32 %v1154_v32, %v1154_v32 }
 0x529   :  { %v1167_v37 = vmul.f32 %v1149_v35, %v1149_v35 }
 0x52a   :  { %v1174_v17 = vsel %vm51_vm0, %v1168_v2, 0.0 }
 0x52b   :  { %1175 = vadd.xlane.f32.xlu1 %v1174_v17  ;;  %v1171_v39 = vsel %vm51_vm0, %v1167_v37, 0.0 }
 0x52c   :  { %1172 = vadd.xlane.f32.xlu0 %v1171_v39 }
 0x52d   :  { %v2137_v40 = vpop.f32.mrb[12].mxu1 }
 0x52e   :  { %v1158_v41 = vpop.f32.mrb[13].mxu1  ;;  %v2732_v42 = vadd.f32 %v2137_v40, %v1069_v30 }
 0x52f   :  { %v1159_v10 = vadd.f32 %v1158_v41, %v1069_v30 }
 0x530   :  { %v1170_v54 = vmul.f32 %v2732_v42, %v2732_v42 }
 0x531   :  { %v2120_v43 = vpop.f32.mrb[6].mxu0  ;;  %v1169_v45 = vmul.f32 %v1159_v10, %v1159_v10 }
 0x532   :  { %v2734_v46 = vadd.f32 %v2120_v43, %v850_v5  ;;  %v930_v47 = vpop.f32.mrb[7].mxu0  ;;  %v1180_v63 = vsel %vm51_vm0, %v1170_v54, 0.0 }
 0x533   :  { %v2736_v11 = vadd.f32 %v930_v47, %v850_v5  ;;  %v1177_v48 = vsel %vm51_vm0, %v1169_v45, 0.0 }
 0x534   :  { %1178 = vadd.xlane.f32.xlu0 %v1177_v48  ;;  %v950_v21 = vmul.f32 %v2734_v46, %v2734_v46 }
 0x535   :  { %v2123_v55 = vpop.f32.mrb[8].mxu0  ;;  %v949_v58 = vmul.f32 %v2736_v11, %v2736_v11 }
 0x536   :  { %v2743_v56 = vadd.f32 %v2123_v55, %v850_v5  ;;  %v940_v59 = vpop.f32.mrb[9].mxu0  ;;  %v956_v60 = vsel %vm51_vm0, %v950_v21, 0.0 }
 0x537   :  { %v2746_v62 = vadd.f32 %v940_v59, %v850_v5  ;;  %957 = vadd.xlane.f32.xlu1 %v956_v60  ;;  %v953_v3 = vsel %vm51_vm0, %v949_v58, 0.0 }
 0x538   :  { %1181 = vadd.xlane.f32.xlu0 %v1180_v63  ;;  %v952_v61 = vmul.f32 %v2743_v56, %v2743_v56 }
 0x539   :  { %v951_v6 = vmul.f32 %v2746_v62, %v2746_v62 }
 0x53a   :  { %v962_v1 = vsel %vm51_vm0, %v952_v61, 0.0 }
 0x53b   :  { %963 = vadd.xlane.f32.xlu1 %v962_v1  ;;  %v959_v53 = vsel %vm51_vm0, %v951_v6, 0.0 }
 0x53c   :  { %954 = vadd.xlane.f32.xlu0 %v953_v3 }
 0x540   :  { %960 = vadd.xlane.f32.xlu0 %v959_v53 }
 0x5b8   :  { %v1176_v0 = vpop.xlane.xlu1 %1175 }
 0x5b9   :  { %v1184_v18 = vmax.f32 %v1176_v0, 1e-24  ;;  %v1173_v12 = vpop.xlane.xlu0 %1172 }
 0x5ba   :  { %v1183_v13 = vmax.f32 %v1173_v12, 1e-24 }
 0x5bb   :  { %2302 = vrsqrt.f32 %v1184_v18 }
 0x5bc   :  { %2304 = vrsqrt.f32 %v1183_v13 }
 0x5c1   :  { %v1179_v14 = vpop.xlane.xlu0 %1178 }
 0x5c2   :  { %v1185_v15 = vmax.f32 %v1179_v14, 1e-24 }
 0x5c4   :  { %2306 = vrsqrt.f32 %v1185_v15  ;;  %v958_v16 = vpop.xlane.xlu1 %957 }
 0x5c5   :  { %v2303_v19 = vpop.eup %2302  ;;  %v966_v20 = vmax.f32 %v958_v16, 1e-24  ;;  %v1182_v57 = vpop.xlane.xlu0 %1181 }
 0x5c6   :  { %v2305_v23 = vpop.eup %2304  ;;  %v1192_v22 = vmul.f32 %v2303_v19, %v1154_v32  ;;  %v1186_v25 = vmax.f32 %v1182_v57, 1e-24 }
 0x5c7   :  { %v1191_v9 = vmul.f32 %v2305_v23, %v1149_v35  ;;  %2308 = vrsqrt.f32 %v966_v20 }
 0x5c8   :  { %2310 = vrsqrt.f32 %v1186_v25  ;;  %v964_v7 = vpop.xlane.xlu1 %963  ;;  %v2758_v33 = vmax.f32 %v1192_v22, 0.0 }
 0x5c9   :  { %v968_v30 = vmax.f32 %v964_v7, 1e-24  ;;  %v955_v28 = vpop.xlane.xlu0 %954  ;;  %v2760_v37 = vmax.f32 %v1191_v9, 0.0 }
 0x5ca   :  { %v965_v2 = vmax.f32 %v955_v28, 1e-24  ;;  %v1214_v40 = vmul.f32 %v2758_v33, %v2758_v33  ;;  %v1200_v43 = vsel %vm51_vm0, %v2758_v33, 0.0 }
 0x5cb   :  { %2312 = vrsqrt.f32 %v968_v30  ;;  %v1213_v35 = vmul.f32 %v2760_v37, %v2760_v37  ;;  %v1199_v45 = vsel %vm51_vm0, %v2760_v37, 0.0 }
 0x5cc   :  { %2314 = vrsqrt.f32 %v965_v2  ;;  %v1218_v54 = vsel %vm51_vm0, %v1214_v40, 0.0  ;;  %v1201_v63 = vadd.f32 %v1200_v43, %v1199_v45 }
 0x5cd   :  { %v961_v17 = vpop.xlane.xlu0 %960  ;;  %v1217_v55 = vsel %vm51_vm0, %v1213_v35, 0.0 }
 0x5ce   :  { %v2307_v39 = vpop.eup %2306  ;;  %v967_v32 = vmax.f32 %v961_v17, 1e-24  ;;  %v1219_v6 = vadd.f32 %v1218_v54, %v1217_v55 }
 0x5cf   :  { %v1193_v41 = vmul.f32 %v2307_v39, %v1159_v10 }
 0x5d0   :  { %2316 = vrsqrt.f32 %v967_v32 }
 0x5d1   :  { %v2309_v5 = vpop.eup %2308  ;;  %v2770_v47 = vmax.f32 %v1193_v41, 0.0 }
 0x5d2   :  { %v2311_v48 = vpop.eup %2310  ;;  %v974_v21 = vmul.f32 %v2309_v5, %v2734_v46 }
 0x5d3   :  { %v1202_v10 = vsel %vm51_vm0, %v2770_v47, 0.0  ;;  %v1215_v59 = vmul.f32 %v2770_v47, %v2770_v47  ;;  %v1194_v60 = vmul.f32 %v2311_v48, %v2732_v42 }
 0x5d4   :  { %v1203_v53 = vadd.f32 %v1202_v10, %v1201_v63  ;;  %v2783_v46 = vmax.f32 %v974_v21, 0.0 }
 0x5d5   :  { %v2313_v58 = vpop.eup %2312  ;;  %v1220_v61 = vsel %vm51_vm0, %v1215_v59, 0.0  ;;  %v2781_v1 = vmax.f32 %v1194_v60, 0.0 }
 0x5d6   :  { %v2315_v3 = vpop.eup %2314  ;;  %v976_v12 = vmul.f32 %v2313_v58, %v2743_v56  ;;  %v1221_v13 = vadd.f32 %v1220_v61, %v1219_v6  ;;  %v996_v20 = vmul.f32 %v2783_v46, %v2783_v46  ;;  %v982_v30 = vsel %vm51_vm0, %v2783_v46, 0.0 }
 0x5d7   :  { %v1204_v0 = vsel %vm51_vm0, %v2781_v1, 0.0  ;;  %v1216_v18 = vmul.f32 %v2781_v1, %v2781_v1  ;;  %v973_v42 = vmul.f32 %v2315_v3, %v2736_v11 }
 0x5d8   :  { %v1205_v14 = vadd.f32 %v1204_v0, %v1203_v53  ;;  %v2796_v22 = vmax.f32 %v976_v12, 0.0  ;;  %v1000_v32 = vsel %vm51_vm0, %v996_v20, 0.0 }
 0x5d9   :  { %v1222_v15 = vsel %vm51_vm0, %v1216_v18, 0.0  ;;  %v2792_v16 = vmax.f32 %v973_v42, 0.0 }
 0x5da   :  { %v2317_v19 = vpop.eup %2316  ;;  %v1206_v57 = vrot.slane %v1205_v14, 4  ;;  %v1223_v23 = vadd.f32 %v1222_v15, %v1221_v13  ;;  %v998_v35 = vmul.f32 %v2796_v22, %v2796_v22  ;;  %v986_v54 = vsel %vm51_vm0, %v2796_v22, 0.0 }
 0x5db   :  { %v981_v25 = vsel %vm51_vm0, %v2792_v16, 0.0  ;;  %v995_v11 = vmul.f32 %v2792_v16, %v2792_v16  ;;  %v975_v56 = vmul.f32 %v2317_v19, %v2746_v62 }
 0x5dc   :  { %v1207_v9 = vadd.f32 %v1206_v57, %v1205_v14  ;;  %v1224_v7 = vrot.slane %v1223_v23, 4  ;;  %v983_v40 = vadd.f32 %v982_v30, %v981_v25  ;;  %v1004_v63 = vsel %vm51_vm0, %v998_v35, 0.0 }
 0x5dd   :  { %v999_v28 = vsel %vm51_vm0, %v995_v11, 0.0  ;;  %v2806_v2 = vmax.f32 %v975_v56, 0.0 }
 0x5de   :  { %v1208_v17 = vrot.slane %v1207_v9, 2  ;;  %v1225_v39 = vadd.f32 %v1224_v7, %v1223_v23  ;;  %v1001_v45 = vadd.f32 %v1000_v32, %v999_v28  ;;  %v1028_v32 = vsub.s32 4, %v2511_v49 }
 0x5df   :  { %v984_v62 = vsel %vm51_vm0, %v2806_v2, 0.0  ;;  %v997_v41 = vmul.f32 %v2806_v2, %v2806_v2 }
 0x5e0   :  { %v1209_v5 = vadd.f32 %v1208_v17, %v1207_v9  ;;  %v1226_v43 = vrot.slane %v1225_v39, 2  ;;  %v985_v48 = vadd.f32 %v984_v62, %v983_v40  ;;  %v1036_v62 = vsub.s32 5, %v2511_v49 }
 0x5e1   :  { %v1002_v21 = vsel %vm51_vm0, %v997_v41, 0.0 }
 0x5e2   :  { %v1210_v55 = vrot.slane %v1209_v5, 1  ;;  %v1227_v10 = vadd.f32 %v1226_v43, %v1225_v39  ;;  %v987_v59 = vadd.f32 %v986_v54, %v985_v48  ;;  %v1003_v60 = vadd.f32 %v1002_v21, %v1001_v45 }
 0x5e3   :  { %v1247_v43 = vrot.slane %v2522_v52, %v1028_v32 }
 0x5e4   :  { %v1228_v58 = vrot.slane %v1227_v10, 1  ;;  %v988_v61 = vrot.slane %v987_v59, 4  ;;  %v1005_v3 = vadd.f32 %v1004_v63, %v1003_v60  ;;  %v1211_v6 = vadd.f32 %v1210_v55, %v1209_v5 }
 0x5e5   :  { %v1255_v55 = vrot.slane %v2522_v52, %v1036_v62 }
 0x5e6   :  { %v1229_v53 = vadd.f32 %v1228_v58, %v1227_v10  ;;  %v989_v0 = vadd.f32 %v988_v61, %v987_v59  ;;  %v1006_v18 = vrot.slane %v1005_v3, 4  ;;  %v1212_v12 = vmul.f32 0.03125, %v1211_v6 }
 0x5e8   :  { %v1230_v42 = vmul.f32 0.03125, %v1229_v53  ;;  %v990_v13 = vrot.slane %v989_v0, 2  ;;  %v1007_v14 = vadd.f32 %v1006_v18, %v1005_v3  ;;  %v1231_v15 = vmul.f32 %v1212_v12, %v1212_v12 }
 0x5e9   :  { %v1235_v5 = vsub.f32 %v2758_v33, %v1212_v12  ;;  %v1234_v45 = vsub.f32 %v2760_v37, %v1212_v12  ;;  %v1236_v48 = vsub.f32 %v2770_v47, %v1212_v12  ;;  %v1237_v49 = vsub.f32 %v2781_v1, %v1212_v12 }
 0x5ea   :  { %v991_v19 = vadd.f32 %v990_v13, %v989_v0  ;;  %v1008_v20 = vrot.slane %v1007_v14, 2  ;;  %v1232_v57 = vsub.f32 %v1230_v42, %v1231_v15  ;;  %v1029_v37 = vrot.slane %v2517_v51, %v1028_v32  ;;  %v2338_v32 = vld [vmem:[%s3030_s1 + $0x8] sm:$0xff] }
 0x5eb   :  { %v1037_v18 = vrot.slane %v2517_v51, %v1036_v62 }
 0x5ec   :  { %v1009_v23 = vadd.f32 %v1008_v20, %v1007_v14  ;;  %v1233_v25 = vmax.f32 %v1232_v57, 0.0  ;;  %v992_v11 = vrot.slane %v991_v19, 1 }
 0x5ee   :  { %v1010_v56 = vrot.slane %v1009_v23, 1  ;;  %v1238_v9 = vadd.f32 1e-05, %v1233_v25  ;;  %v993_v7 = vadd.f32 %v992_v11, %v991_v19  ;;  %v1455_v25 = vld [vmem:[%s3037_s4] sm:$0xff]  ;;  %v1456_v11 = vld [vmem:[%s3037_s4 + $0x8] sm:$0xff] }
 0x5f0   :  { %v1011_v30 = vadd.f32 %v1010_v56, %v1009_v23  ;;  %2318 = vrsqrt.f32 %v1238_v9  ;;  %v994_v28 = vmul.f32 0.03125, %v993_v7 }
 0x5f2   :  { %v1012_v17 = vmul.f32 0.03125, %v1011_v30  ;;  %v1013_v39 = vmul.f32 %v994_v28, %v994_v28  ;;  %v1016_v52 = vsub.f32 %v2792_v16, %v994_v28  ;;  %v1017_v1 = vsub.f32 %v2783_v46, %v994_v28 }
 0x5f3   :  { %v1018_v53 = vsub.f32 %v2806_v2, %v994_v28  ;;  %v1019_v16 = vsub.f32 %v2796_v22, %v994_v28 }
 0x5f4   :  { %v1014_v40 = vsub.f32 %v1012_v17, %v1013_v39  ;;  %v2244_v17 = vpack.c.bf16 %v1456_v11, %v1455_v25 }
 0x5f6   :  { %v1015_v35 = vmax.f32 %v1014_v40, 0.0 }
 0x5f8   :  { %v1020_v41 = vadd.f32 1e-05, %v1015_v35 }
 0x5fa   :  { %v2319_v54 = vpop.eup %2318  ;;  %2320 = vrsqrt.f32 %v1020_v41 }
 0x5fb   :  { %v1241_v21 = vmul.f32 %v2319_v54, %v1235_v5  ;;  %v1240_v10 = vmul.f32 %v2319_v54, %v1234_v45  ;;  %v1242_v59 = vmul.f32 %v2319_v54, %v1236_v48  ;;  %v1243_v3 = vmul.f32 %v2319_v54, %v1237_v49  ;;  %v2339_v5 = vld [vmem:[%s3030_s1 + $0x18] sm:$0xff]  ;;  %v1611_v54 = vld [vmem:[%s3038_s11] sm:$0xff] }
 0x5fc   :  { %v1458_v45 = vld [vmem:[%s3037_s4 + $0x18] sm:$0xff] }
 0x5fd   :  { %v1249_v60 = vmul.f32 %v1247_v43, %v1241_v21  ;;  %v1248_v63 = vmul.f32 %v1247_v43, %v1240_v10  ;;  %v1250_v61 = vmul.f32 %v1247_v43, %v1242_v59  ;;  %v1251_v6 = vmul.f32 %v1247_v43, %v1243_v3  ;;  %v1457_v43 = vld [vmem:[%s3037_s4 + $0x10] sm:$0xff]  ;;  %v1612_v21 = vld [vmem:[%s3038_s11 + $0x8] sm:$0xff]  ;;  %v1614_v59 = vld [vmem:[%s3038_s11 + $0x18] sm:$0xff] }
 0x5fe   :  { %v2248_v48 = vpack.c.bf16 %v1458_v45, %v1457_v43  ;;  %v2252_v10 = vpack.c.bf16 %v1612_v21, %v1611_v54  ;;  %v1770_v43 = vld [vmem:[%s3040_s5] sm:$0xff]  ;;  %v1771_v45 = vld [vmem:[%s3040_s5 + $0x8] sm:$0xff]  ;;  %v1773_v21 = vld [vmem:[%s3040_s5 + $0x18] sm:$0xff] }
 0x5ff   :  { %v2827_v58 = vadd.f32 %v1255_v55, %v1249_v60  ;;  %v2829_v33 = vadd.f32 %v1255_v55, %v1248_v63  ;;  %v2837_v47 = vadd.f32 %v1255_v55, %v1250_v61  ;;  %v2845_v14 = vadd.f32 %v1255_v55, %v1251_v6  ;;  %v1613_v55 = vld [vmem:[%s3038_s11 + $0x10] sm:$0xff] }
 0x600   :  { %v2256_v60 = vpack.c.bf16 %v1614_v59, %v1613_v55  ;;  %v2260_v54 = vpack.c.bf16 %v1771_v45, %v1770_v43 }
 0x601   :  { %1266 = vrot.lane.b32.xlu1 %v2827_v58, %s2341_s6  ;;  %1264 = vrot.lane.b32.xlu0 %v2829_v33, %s2341_s6 }
 0x604   :  { %v2321_v0 = vpop.eup %2320 }
 0x605   :  { %1268 = vrot.lane.b32.xlu1 %v2837_v47, %s2341_s6  ;;  %v1022_v12 = vmul.f32 %v2321_v0, %v1016_v52  ;;  %v1023_v42 = vmul.f32 %v2321_v0, %v1017_v1  ;;  %v1024_v13 = vmul.f32 %v2321_v0, %v1018_v53  ;;  %v1025_v20 = vmul.f32 %v2321_v0, %v1019_v16 }
 0x607   :  { %v1030_v15 = vmul.f32 %v1029_v37, %v1022_v12  ;;  %v1031_v19 = vmul.f32 %v1029_v37, %v1023_v42  ;;  %v1032_v2 = vmul.f32 %v1029_v37, %v1024_v13  ;;  %v1033_v57 = vmul.f32 %v1029_v37, %v1025_v20 }
 0x609   :  { %1270 = vrot.lane.b32.xlu1 %v2845_v14, %s2341_s6  ;;  %v1038_v46 = vadd.f32 %v1037_v18, %v1030_v15  ;;  %v1039_v51 = vadd.f32 %v1037_v18, %v1031_v19  ;;  %v1040_v23 = vadd.f32 %v1037_v18, %v1032_v2  ;;  %v1041_v22 = vadd.f32 %v1037_v18, %v1033_v57 }
 0x60b   :  { %1439 = vrot.lane.b32.xlu0 %v1038_v46, %s2341_s6 }
 0x60d   :  { %1441 = vrot.lane.b32.xlu1 %v1039_v51, %s2341_s6 }
 0x60f   :  { %1443 = vrot.lane.b32.xlu0 %v1040_v23, %s2341_s6 }
 0x611   :  { %1445 = vrot.lane.b32.xlu1 %v1041_v22, %s2341_s6 }
 0x673   :  { %v2859_v56 = vpop.permute.xlu1 %1266  ;;  %v2861_v9 = vpop.permute.xlu0 %1264 }
 0x674   :  { %v1277_v7 = vsel %vm51_vm0, %v1039_v51, %v2859_v56  ;;  %v1276_v30 = vsel %vm51_vm0, %v1038_v46, %v2861_v9  ;;  %v1970_v51 = vld [vmem:[%s3039_s7] ss:$0 sm:$0xff] }
 0x675   :  { %v2236_v28 = vpack.c.bf16 %v1277_v7, %v1276_v30 }
 0x677   :  { %v2867_v39 = vpop.permute.xlu1 %1268  ;;  %2237 = vmatprep.subr.bf16.mxu0 %v2236_v28 }
 0x678   :  { %2239 = vmatpush3.bf16.msra.mxu0 %v2236_v28  ;;  %v1278_v35 = vsel %vm51_vm0, %v1040_v23, %v2867_v39 }
 0x679   :  { %2245 = vmatprep.subr.bf16.mxu0 %v2244_v17 }
 0x67b   :  { %v1271_v40 = vpop.permute.xlu1 %1270  ;;  %2143 = vmatmul.mubr.msk.f32.vlgmr.msra.gmra.mrb[10].mxu0 %vm51_vm0, %v2338_v32 }
 0x67c   :  { %v1279_v62 = vsel %vm51_vm0, %v1041_v22, %v1271_v40  ;;  %2247 = vmatpush3.bf16.msra.mxu0 %v2244_v17 }
 0x67d   :  { %v2240_v41 = vpack.c.bf16 %v1279_v62, %v1278_v35  ;;  %2249 = vmatprep.subr.bf16.mxu0 %v2248_v48  ;;  %v2900_v52 = vpop.permute.xlu0 %1439 }
 0x67f   :  { %2241 = vmatprep.subr.bf16.mxu1 %v2240_v41  ;;  %v2903_v37 = vpop.permute.xlu1 %1441 }
 0x680   :  { %2243 = vmatpush3.bf16.msra.mxu1 %v2240_v41  ;;  %2251 = vmatpush3.bf16.msra.mxu0 %v2248_v48  ;;  %v1772_v48 = vld [vmem:[%s3040_s5 + $0x10] sm:$0xff] }
 0x681   :  { %2253 = vmatprep.subr.bf16.mxu1 %v2252_v10  ;;  %v2914_v18 = vpop.permute.xlu0 %1443  ;;  %v2264_v55 = vpack.c.bf16 %v1773_v21, %v1772_v48  ;;  %2261 = vmatprep.subr.bf16.mxu0 %v2260_v54 }
 0x683   :  { %2150 = vmatmul.mubr.msk.f32.vlgmr.msra.gmra.mrb[14].mxu1 %vm51_vm0, %v2339_v5  ;;  %v2917_v12 = vpop.permute.xlu1 %1445 }
 0x684   :  { %2255 = vmatpush3.bf16.msra.mxu1 %v2252_v10 }
 0x685   :  { %2257 = vmatprep.subr.bf16.mxu1 %v2256_v60 }
 0x688   :  { %2259 = vmatpush3.bf16.msra.mxu1 %v2256_v60 }
 0x74e   :  { %v2144_v63 = vpop.f32.mrb[10].mxu0 }
 0x74f   :  { %v1431_v49 = vmul.f32 %v2485_v29, %v2144_v63  ;;  %v1346_v61 = vpop.f32.mrb[11].mxu0 }
 0x750   :  { %v1430_v3 = vmul.f32 %v2489_v34, %v1346_v61 }
 0x751   :  { %1597 = vrot.lane.b32.xlu1 %v1431_v49, %s2342_s2  ;;  %v1452_v1 = vsel %vm51_vm0, %v1431_v49, %v2903_v37 }
 0x752   :  { %1595 = vrot.lane.b32.xlu0 %v1430_v3, %s2342_s2  ;;  %v1451_v6 = vsel %vm51_vm0, %v1430_v3, %v2900_v52  ;;  %v1774_v3 = vld [vmem:[%s3040_s5 + $0x20] sm:$0xff] }
 0x753   :  { %2160 = vmatprep.mubr.msk.f32.mxu0 %vm851_vm2, %v1451_v6 }
 0x754   :  { %2161 = vmatmul.mubr.msk.f32.vlgmr.msra.gmra.mrb[12].mxu0 %vm851_vm2, %v1452_v1 }
 0x755   :  { %2263 = vmatpush3.bf16.msra.mxu0 %v2260_v54 }
 0x756   :  { %v2151_v29 = vpop.f32.mrb[14].mxu1  ;;  %2265 = vmatprep.subr.bf16.mxu0 %v2264_v55 }
 0x757   :  { %v1433_v34 = vmul.f32 %v2492_v38, %v2151_v29  ;;  %v1421_v53 = vpop.f32.mrb[15].mxu1 }
 0x758   :  { %v1432_v0 = vmul.f32 %v2487_v31, %v1421_v53 }
 0x759   :  { %1601 = vrot.lane.b32.xlu1 %v1433_v34, %s2342_s2  ;;  %v1454_v13 = vsel %vm51_vm0, %v1433_v34, %v2917_v12  ;;  %2267 = vmatpush3.bf16.msra.mxu0 %v2264_v55 }
 0x75a   :  { %1599 = vrot.lane.b32.xlu0 %v1432_v0, %s2342_s2  ;;  %v1453_v42 = vsel %vm51_vm0, %v1432_v0, %v2914_v18  ;;  %2188 = vmatprep.subr.mxu0 %v1774_v3 }
 0x75b   :  { %2163 = vmatprep.mubr.msk.f32.mxu0 %vm851_vm2, %v1453_v42 }
 0x75c   :  { %2164 = vmatmul.mubr.msk.f32.gmra.mrb[14].mxu0 %vm851_vm2, %v1454_v13 }
 0x75d   :  { %2189 = vmatpush3.msra.mxu0 %v1774_v3 }
 0x7c3   :  { %v1598_v38 = vpop.permute.xlu1 %1597 }
 0x7c4   :  { %v1596_v31 = vpop.permute.xlu0 %1595  ;;  %v1608_v15 = vsel %vm51_vm0, %v1598_v38, %v2859_v56 }
 0x7c5   :  { %v1607_v16 = vsel %vm51_vm0, %v1596_v31, %v2861_v9 }
 0x7c6   :  { %2174 = vmatprep.mubr.msk.f32.mxu1 %vm851_vm2, %v1607_v16 }
 0x7c7   :  { %2175 = vmatmul.mubr.msk.f32.vlgmr.msra.gmra.mrb[16].mxu1 %vm851_vm2, %v1608_v15 }
 0x7cb   :  { %v1602_v19 = vpop.permute.xlu1 %1601 }
 0x7cc   :  { %v1600_v20 = vpop.permute.xlu0 %1599  ;;  %v1610_v2 = vsel %vm51_vm0, %v1602_v19, %v1271_v40  ;;  %v1975_v19 = vld [vmem:[%s3041_s13] ss:$0 sm:$0xff]  ;;  %s2344_s13 = smov 24  }
 0x7cd   :  { %v1609_v46 = vsel %vm51_vm0, %v1600_v20, %v2867_v39 }
 0x7ce   :  { %2177 = vmatprep.mubr.msk.f32.mxu1 %vm851_vm2, %v1609_v46 }
 0x7cf   :  { %2178 = vmatmul.mubr.msk.f32.gmra.mrb[18].mxu1 %vm851_vm2, %v1610_v2 }
 0x827   :  { %v2162_v57 = vpop.f32.mrb[12].mxu0 }
 0x828   :  { %v1549_v23 = vadd.f32 %v2162_v57, %v1970_v51  ;;  %v1543_v22 = vpop.f32.mrb[13].mxu0 }
 0x829   :  { %v1544_v25 = vadd.f32 %v1970_v51, %v1543_v22 }
 0x82a   :  { %v1563_v11 = vmul.f32 %v1549_v23, %v1549_v23 }
 0x82b   :  { %v1562_v56 = vmul.f32 %v1544_v25, %v1544_v25 }
 0x82c   :  { %v1569_v9 = vsel %vm264_vm1, %v1563_v11, 0.0 }
 0x82d   :  { %1570 = vadd.xlane.f32.xlu1 %v1569_v9  ;;  %v1566_v7 = vsel %vm264_vm1, %v1562_v56, 0.0 }
 0x82e   :  { %1567 = vadd.xlane.f32.xlu0 %v1566_v7 }
 0x82f   :  { %v2165_v30 = vpop.f32.mrb[14].mxu0 }
 0x830   :  { %v1553_v28 = vpop.f32.mrb[15].mxu0  ;;  %v1559_v17 = vadd.f32 %v2165_v30, %v1970_v51 }
 0x831   :  { %v1554_v39 = vadd.f32 %v1970_v51, %v1553_v28 }
 0x832   :  { %v1565_v35 = vmul.f32 %v1559_v17, %v1559_v17 }
 0x833   :  { %v1564_v40 = vmul.f32 %v1554_v39, %v1554_v39 }
 0x834   :  { %v1575_v62 = vsel %vm264_vm1, %v1565_v35, 0.0 }
 0x835   :  { %v1572_v32 = vsel %vm264_vm1, %v1564_v40, 0.0 }
 0x836   :  { %1573 = vadd.xlane.f32.xlu0 %v1572_v32 }
 0x83a   :  { %1576 = vadd.xlane.f32.xlu0 %v1575_v62 }
 0x89a   :  { %v2176_v41 = vpop.f32.mrb[16].mxu1 }
 0x89b   :  { %v1699_v5 = vpop.f32.mrb[17].mxu1  ;;  %v1705_v56 = vadd.f32 %v2176_v41, %v1975_v19 }
 0x89c   :  { %v1700_v20 = vadd.f32 %v1975_v19, %v1699_v5 }
 0x89d   :  { %v1719_v9 = vmul.f32 %v1705_v56, %v1705_v56 }
 0x89e   :  { %v1718_v2 = vmul.f32 %v1700_v20, %v1700_v20 }
 0x89f   :  { %v1725_v7 = vsel %vm51_vm0, %v1719_v9, 0.0 }
 0x8a0   :  { %v1722_v57 = vsel %vm51_vm0, %v1718_v2, 0.0 }
 0x8a2   :  { %v2179_v10 = vpop.f32.mrb[18].mxu1 }
 0x8a3   :  { %v1709_v59 = vpop.f32.mrb[19].mxu1  ;;  %v1715_v51 = vadd.f32 %v2179_v10, %v1975_v19 }
 0x8a4   :  { %v1710_v46 = vadd.f32 %v1975_v19, %v1709_v59 }
 0x8ba   :  { %v1571_v60 = vpop.xlane.xlu1 %1570 }
 0x8bb   :  { %v1579_v63 = vmax.f32 %v1571_v60, 1e-24  ;;  %v1568_v49 = vpop.xlane.xlu0 %1567  ;;  %v1980_v60 = vld [vmem:[%s3042_s8] ss:$0 sm:$0xff] }
 0x8bc   :  { %v1578_v61 = vmax.f32 %v1568_v49, 1e-24 }
 0x8bd   :  { %2322 = vrsqrt.f32 %v1579_v63 }
 0x8be   :  { %2324 = vrsqrt.f32 %v1578_v61 }
 0x8c3   :  { %v1574_v6 = vpop.xlane.xlu0 %1573 }
 0x8c4   :  { %v1580_v1 = vmax.f32 %v1574_v6, 1e-24 }
 0x8c6   :  { %2326 = vrsqrt.f32 %v1580_v1 }
 0x8c7   :  { %v2323_v29 = vpop.eup %2322  ;;  %v1577_v34 = vpop.xlane.xlu0 %1576 }
 0x8c8   :  { %v2325_v53 = vpop.eup %2324  ;;  %v1581_v0 = vmax.f32 %v1577_v34, 1e-24  ;;  %v1587_v42 = vmul.f32 %v2323_v29, %v1549_v23  ;;  %v1720_v23 = vmul.f32 %v1710_v46, %v1710_v46 }
 0x8c9   :  { %v1586_v13 = vmul.f32 %v2325_v53, %v1544_v25  ;;  %v1721_v25 = vmul.f32 %v1715_v51, %v1715_v51 }
 0x8ca   :  { %2328 = vrsqrt.f32 %v1581_v0  ;;  %1752 = vrot.lane.b32.xlu1 %v1587_v42, %s2343_s23  ;;  %v1728_v22 = vsel %vm51_vm0, %v1720_v23, 0.0 }
 0x8cb   :  { %1750 = vrot.lane.b32.xlu0 %v1586_v13, %s2343_s23  ;;  %v1731_v11 = vsel %vm51_vm0, %v1721_v25, 0.0 }
 0x8d0   :  { %v2327_v38 = vpop.eup %2326 }
 0x8d1   :  { %v1588_v31 = vmul.f32 %v2327_v38, %v1554_v39 }
 0x8d3   :  { %1754 = vrot.lane.b32.xlu1 %v1588_v31, %s2343_s23 }
 0x8d4   :  { %v2329_v16 = vpop.eup %2328 }
 0x8d5   :  { %v1589_v15 = vmul.f32 %v2329_v16, %v1559_v17 }
 0x8d7   :  { %1756 = vrot.lane.b32.xlu1 %v1589_v15, %s2343_s23 }
 0x8ea   :  { %1723 = vadd.xlane.f32.xlu0 %v1722_v57 }
 0x8ee   :  { %1729 = vadd.xlane.f32.xlu0 %v1728_v22 }
 0x8f2   :  { %1732 = vadd.xlane.f32.xlu0 %v1731_v11 }
 0x8fb   :  { %1726 = vadd.xlane.f32.xlu1 %v1725_v7 }
 0x908   :  { %1880 = vrot.lane.b32.xlu0 %v2625_v50, %s2340_s28  ;;  %v1762_v50 = vsel %vm51_vm0, %v2647_v44, %v2900_v52 }
 0x90c   :  { %1892 = vrot.lane.b32.xlu0 %v2829_v33, %s2344_s13  ;;  %1882 = vrot.lane.b32.xlu1 %v2623_v4, %s2340_s28  ;;  %v1763_v4 = vsel %vm51_vm0, %v2645_v36, %v2903_v37  ;;  %v1765_v36 = vsel %vm51_vm0, %v2651_v27, %v2917_v12 }
 0x910   :  { %1896 = vrot.lane.b32.xlu0 %v2837_v47, %s2344_s13  ;;  %1884 = vrot.lane.b32.xlu1 %v2633_v8, %s2340_s28 }
 0x914   :  { %1886 = vrot.lane.b32.xlu1 %v2641_v24, %s2340_s28  ;;  %v1764_v24 = vsel %vm51_vm0, %v2649_v26, %v2914_v18  ;;  %s2345_s28 = smov 40  }
 0x918   :  { %1894 = vrot.lane.b32.xlu1 %v2827_v58, %s2344_s13 }
 0x91c   :  { %1898 = vrot.lane.b32.xlu1 %v2845_v14, %s2344_s13 }
 0x93c   :  { %v1753_v30 = vpop.permute.xlu1 %1752 }
 0x93d   :  { %v1751_v33 = vpop.permute.xlu0 %1750  ;;  %v1767_v47 = vsel %vm851_vm2, %v1763_v4, %v1753_v30 }
 0x93e   :  { %v1766_v8 = vsel %vm851_vm2, %v1762_v50, %v1751_v33 }
 0x93f   :  { %2190 = vmatprep.mubr.msk.f32.mxu0 %vm1782_vm3, %v1766_v8 }
 0x940   :  { %2191 = vmatmul.mubr.msk.f32.vlgmr.msra.gmra.mrb[16].mxu0 %vm1782_vm3, %v1767_v47 }
 0x945   :  { %v1755_v58 = vpop.permute.xlu1 %1754 }
 0x946   :  { %v1768_v44 = vsel %vm851_vm2, %v1764_v24, %v1755_v58 }
 0x947   :  { %2193 = vmatprep.mubr.msk.f32.mxu0 %vm1782_vm3, %v1768_v44 }
 0x949   :  { %v1757_v14 = vpop.permute.xlu1 %1756 }
 0x94a   :  { %v1769_v52 = vsel %vm851_vm2, %v1765_v36, %v1757_v14 }
 0x94b   :  { %2194 = vmatmul.mubr.msk.f32.gmra.mrb[18].mxu0 %vm1782_vm3, %v1769_v52 }
 0x977   :  { %v1724_v37 = vpop.xlane.xlu0 %1723 }
 0x978   :  { %v1734_v28 = vmax.f32 %v1724_v37, 1e-24 }
 0x97a   :  { %2330 = vrsqrt.f32 %v1734_v28 }
 0x97b   :  { %v1730_v17 = vpop.xlane.xlu0 %1729 }
 0x97c   :  { %v1736_v39 = vmax.f32 %v1730_v17, 1e-24 }
 0x97e   :  { %2332 = vrsqrt.f32 %v1736_v39 }
 0x97f   :  { %v1733_v40 = vpop.xlane.xlu0 %1732 }
 0x980   :  { %v1737_v62 = vmax.f32 %v1733_v40, 1e-24 }
 0x983   :  { %v1881_v55 = vpop.permute.xlu0 %1880 }
 0x984   :  { %v2331_v26 = vpop.eup %2330 }
 0x985   :  { %v1742_v18 = vmul.f32 %v2331_v26, %v1700_v20 }
 0x987   :  { %1908 = vrot.lane.b32.xlu0 %v1742_v18, %s2345_s28  ;;  %v1893_v59 = vpop.permute.xlu0 %1892 }
 0x988   :  { %v2333_v32 = vpop.eup %2332  ;;  %v1727_v35 = vpop.xlane.xlu1 %1726 }
 0x989   :  { %v1735_v27 = vmax.f32 %v1727_v35, 1e-24  ;;  %v1744_v12 = vmul.f32 %v2333_v32, %v1710_v46 }
 0x98b   :  { %2334 = vrsqrt.f32 %v1735_v27  ;;  %1912 = vrot.lane.b32.xlu0 %v1744_v12, %s2345_s28  ;;  %v1897_v61 = vpop.permute.xlu0 %1896 }
 0x98c   :  { %2336 = vrsqrt.f32 %v1737_v62  ;;  %v1883_v48 = vpop.permute.xlu1 %1882 }
 0x990   :  { %v1885_v54 = vpop.permute.xlu1 %1884 }
 0x994   :  { %v1887_v21 = vpop.permute.xlu1 %1886 }
 0x995   :  { %v2335_v41 = vpop.eup %2334 }
 0x996   :  { %v1743_v5 = vmul.f32 %v2335_v41, %v1705_v56  ;;  %v2337_v43 = vpop.eup %2336 }
 0x997   :  { %v1745_v45 = vmul.f32 %v2337_v43, %v1715_v51 }
 0x998   :  { %1910 = vrot.lane.b32.xlu1 %v1743_v5, %s2345_s28  ;;  %v1895_v10 = vpop.permute.xlu1 %1894 }
 0x99c   :  { %1914 = vrot.lane.b32.xlu1 %v1745_v45, %s2345_s28  ;;  %v1899_v63 = vpop.permute.xlu1 %1898 }
 0x9f9   :  { %v1909_v42 = vpop.permute.xlu0 %1908 }
 0x9fd   :  { %v1913_v23 = vpop.permute.xlu0 %1912 }
 0xa0a   :  { %v1911_v34 = vpop.permute.xlu1 %1910 }
 0xa0e   :  { %v1915_v2 = vpop.permute.xlu1 %1914 }
 0xa13   :  { %v2192_v49 = vpop.f32.mrb[16].mxu0 }
 0xa14   :  { %v1867_v3 = vadd.f32 %v2192_v49, %v1980_v60  ;;  %v1861_v6 = vpop.f32.mrb[17].mxu0 }
 0xa15   :  { %v1862_v1 = vadd.f32 %v1980_v60, %v1861_v6 }
 0xa16   :  { %v1921_v29 = vsel %vm264_vm1, %v1867_v3, %v1883_v48 }
 0xa17   :  { %v1926_v53 = vsel %vm1924_vm4, %v1921_v29, %v1895_v10  ;;  %v1920_v0 = vsel %vm264_vm1, %v1862_v1, %v1881_v55 }
 0xa18   :  { %v1930_v13 = vsel %vm1782_vm3, %v1926_v53, %v1911_v34  ;;  %v1925_v38 = vsel %vm1924_vm4, %v1920_v0, %v1893_v59 }
 0xa19   :  { %1935 = vst.msk [vmem:[%s3043_s14 + $0x8] sm:$0xff] %vm1933_vm5, %v1930_v13  ;;  %v1929_v31 = vsel %vm1782_vm3, %v1925_v38, %v1909_v42 }
 0xa1a   :  { %1934 = vst.msk [vmem:[%s3043_s14] sm:$0xff] %vm1933_vm5, %v1929_v31 }
 0xa1e   :  { %v2195_v16 = vpop.f32.mrb[18].mxu0 }
 0xa1f   :  { %v1877_v15 = vadd.f32 %v2195_v16, %v1980_v60  ;;  %v1871_v19 = vpop.f32.mrb[19].mxu0 }
 0xa20   :  { %v1872_v20 = vadd.f32 %v1980_v60, %v1871_v19 }
 0xa21   :  { %v1923_v46 = vsel %vm264_vm1, %v1877_v15, %v1887_v21 }
 0xa22   :  { %v1928_v51 = vsel %vm1924_vm4, %v1923_v46, %v1899_v63  ;;  %v1922_v57 = vsel %vm264_vm1, %v1872_v20, %v1885_v54 }
 0xa23   :  { %v1932_v22 = vsel %vm1782_vm3, %v1928_v51, %v1915_v2  ;;  %v1927_v25 = vsel %vm1924_vm4, %v1922_v57, %v1897_v61 }
 0xa24   :  { %1937 = vst.msk [vmem:[%s3043_s14 + $0x18] sm:$0xff] %vm1933_vm5, %v1932_v22  ;;  %v1931_v11 = vsel %vm1782_vm3, %v1927_v25, %v1913_v23 }
 0xa25   :  { %1936 = vst.msk [vmem:[%s3043_s14 + $0x10] sm:$0xff] %vm1933_vm5, %v1931_v11 }

</bundles_post_ra>
